<compile_context>
chip_gen: v5e
topology: v5e:2x2
jax: 0.10.0
libtpu: 0.0.40
codegen_flags: <defaults>
</compile_context>

<pallas_src>
import functools

import jax
import jax.numpy as jnp
from jax import lax
from jax.experimental import pallas as pl
from jax.experimental.pallas import tpu as pltpu


def _round_up(n, m):
    return ((n + m - 1) // m) * m


def _num_tensorcores():
    """v7x has 2 TensorCores per chip; v5e/v6e (and older) have 1."""
    try:
        kind = jax.devices()[0].device_kind.lower()
    except Exception:
        return 1
    return 2 if "7" in kind else 1


def _default_batch_tile(batch):
    # Whole net is ~84 MFLOP / <1 MiB resident -> overhead bound.  Use one grid
    # step per TensorCore; multiple of 128 keeps the (1, bt) output block legal
    # and the bf16 LHS sublane-aligned.  Cap only matters for huge batches.
    n_tc = _num_tensorcores()
    bt = _round_up(pl.cdiv(batch, n_tc), 128)
    return min(bt, 2048)


def _deepnet_kernel(x_ref,
                    w1_ref, b1_ref,
                    w2_ref, b2_ref,
                    w3_ref, b3_ref,
                    w4_ref, b4_ref,
                    w5_ref, b5_ref,
                    w6_ref, b6_ref,
                    o_ref):
    """Whole 6-layer MLP forward for one batch tile, fully resident in VMEM."""
    h = x_ref[...]  # (bt, D_pad) bf16 — pre-cast / pre-padded on the host side.

    def dense_relu(h, w_ref, b_ref):
        # bf16 operands into the MXU, f32 accumulation; bias add + ReLU stay in
        # f32 on the VPU; activation stored back as bf16 so only the bf16 copy
        # stays live across layers (halves vreg pressure vs f32 + bf16 copies).
        y = jnp.dot(h, w_ref[...], preferred_element_type=jnp.float32)
        return jnp.maximum(y + b_ref[...], 0.0).astype(jnp.bfloat16)

    h = dense_relu(h, w1_ref, b1_ref)
    h = dense_relu(h, w2_ref, b2_ref)
    h = dense_relu(h, w3_ref, b3_ref)
    h = dense_relu(h, w4_ref, b4_ref)
    h = dense_relu(h, w5_ref, b5_ref)
    # (Optional v5e/v6e micro-opt: interleave two half-tiles through the layer
    #  chain to hide MRF drain; only worth it if a bundle dump shows MXU gaps.)

    # Output layer (H -> 1) written lane-dense as a (1, bt) row:
    #   (1, H) . (bt, H)^T -> (1, bt)  (contract the last dim of both operands)
    out = lax.dot_general(w6_ref[...], h,
                          dimension_numbers=(((1,), (1,)), ((), ())),
                          preferred_element_type=jnp.float32)
    o_ref[...] = (out + b6_ref[0, 0]).astype(o_ref.dtype)


@functools.partial(jax.jit, static_argnames=("batch_tile",))
def _deepnet_forward_impl(x, params, batch_tile):
    B, D = x.shape
    H = params["w1"].shape[1]
    bt = batch_tile

    # ---- parameter prep (tiny, fused into the jit) -------------------------
    w_hid = [params[f"w{i}"].astype(jnp.bfloat16) for i in range(1, 6)]
    b_hid = [params[f"b{i}"].reshape(1, H).astype(jnp.float32) for i in range(1, 6)]
    w6 = params["w6"].reshape(1, H).astype(jnp.bfloat16)   # lane-dense row
    b6 = params["b6"].reshape(1, 1).astype(jnp.float32)    # SMEM scalar

    # Pad the tiny layer-1 contraction dim to a full bf16 sublane tile (16) and
    # pre-cast x to bf16 outside the kernel (exact: padded zeros contribute 0).
    D_pad = max(_round_up(D, 16), 16)
    if D_pad != D:
        x = jnp.pad(x, ((0, 0), (0, D_pad - D)))
        w_hid[0] = jnp.pad(w_hid[0], ((0, D_pad - D), (0, 0)))
    x = x.astype(jnp.bfloat16)

    # Pad the batch so the grid divides evenly; pad rows are sliced off below.
    B_pad = _round_up(B, bt)
    if B_pad != B:
        x = jnp.pad(x, ((0, B_pad - B), (0, 0)))

    # Constant-index weight/bias blocks: fetched once, single-buffered.
    const = lambda shape: pl.BlockSpec(shape, lambda i: (0, 0),
                                       pipeline_mode=pl.Buffered(1))

    in_specs = [
        pl.BlockSpec((bt, D_pad), lambda i: (i, 0)),        # x: tiled over batch
        const((D_pad, H)), const((1, H)),                   # layer 1
        const((H, H)), const((1, H)),                       # layer 2
        const((H, H)), const((1, H)),                       # layer 3
        const((H, H)), const((1, H)),                       # layer 4
        const((H, H)), const((1, H)),                       # layer 5
        const((1, H)),                                      # w6 (lane-dense row)
        pl.BlockSpec(memory_space=pltpu.MemorySpace.SMEM),  # b6 scalar
    ]
    # Lane-dense output: a (1, B_pad) row, one (1, bt) block per grid step.
    out_spec = pl.BlockSpec((1, bt), lambda i: (0, i))

    out = pl.pallas_call(
        _deepnet_kernel,
        out_shape=jax.ShapeDtypeStruct((1, B_pad), jnp.float32),
        grid_spec=pltpu.PrefetchScalarGridSpec(
            num_scalar_prefetch=0,
            grid=(B_pad // bt,),
            in_specs=in_specs,
            out_specs=out_spec,
        ),
        compiler_params=pltpu.CompilerParams(
            dimension_semantics=("parallel",),   # shard batch across TCs on v7x
        ),
    )(
        x,
        w_hid[0], b_hid[0],
        w_hid[1], b_hid[1],
        w_hid[2], b_hid[2],
        w_hid[3], b_hid[3],
        w_hid[4], b_hid[4],
        w6, b6,
    )
    return out[0, :B].reshape(B, 1)


def deepnet_forward(x, params, *, batch_tile=None):
    """x: (B, input_dim) f32. params: w1..w6 as (in, out), b1..b6 as (1, out)."""
    if batch_tile is None:
        batch_tile = _default_batch_tile(x.shape[0])
    else:
        batch_tile = max(128, _round_up(int(batch_tile), 128))
    return _deepnet_forward_impl(x, params, batch_tile)


def init_params(key, input_dim, hidden_dim):
    """Deterministic synthetic parameters (nn.Linear shapes, transposed), f32."""
    dims = [(input_dim, hidden_dim)] + [(hidden_dim, hidden_dim)] * 4 + [(hidden_dim, 1)]
    params = {}
    for idx, (fan_in, fan_out) in enumerate(dims, start=1):
        key, kw, kb = jax.random.split(key, 3)
        bound = 1.0 / jnp.sqrt(jnp.float32(fan_in))
        params[f"w{idx}"] = jax.random.uniform(
            kw, (fan_in, fan_out), jnp.float32, -bound, bound)
        params[f"b{idx}"] = jax.random.uniform(
            kb, (1, fan_out), jnp.float32, -bound, bound)
    return params


def deepnet_reference(x, params):
    """Pure-JAX f32 reference of the PyTorch forward."""
    h = x
    for i in range(1, 6):
        h = jnp.maximum(h @ params[f"w{i}"] + params[f"b{i}"], 0.0)
    return h @ params["w6"] + params["b6"]


if __name__ == "__main__":
    # Small shapes consistent with DeepNet(input_dim=4, hidden_dim=128).
    B, INPUT_DIM, HIDDEN_DIM = 512, 4, 128

    key = jax.random.PRNGKey(0)
    key, kx = jax.random.split(key)
    x = jax.random.normal(kx, (B, INPUT_DIM), jnp.float32)

    params = init_params(key, INPUT_DIM, HIDDEN_DIM)

    out = deepnet_forward(x, params)   # grid = 1 (v5e/v6e) or 2 (v7x)
    out = jax.block_until_ready(out)

    ref = deepnet_reference(x, params)
    assert out.shape == (B, 1)
    # bf16 MXU operands / bf16-resident activations (f32 accumulation) ->
    # loosened tolerance vs the f32 reference.
    max_err = float(jnp.max(jnp.abs(out - ref)))
    assert jnp.allclose(out, ref, atol=5e-2, rtol=5e-2), f"mismatch: max abs err {max_err}"

    print("KERNEL_OK")
</pallas_src>

<mosaic_0001>
module attributes {stable_mosaic.version = 11 : i64} {
  func.func @_deepnet_kernel(%arg0: i32, %arg1: memref<512x16xbf16, #tpu.memory_space<vmem>>, %arg2: memref<16x128xbf16, #tpu.memory_space<vmem>>, %arg3: memref<1x128xf32, #tpu.memory_space<vmem>>, %arg4: memref<128x128xbf16, #tpu.memory_space<vmem>>, %arg5: memref<1x128xf32, #tpu.memory_space<vmem>>, %arg6: memref<128x128xbf16, #tpu.memory_space<vmem>>, %arg7: memref<1x128xf32, #tpu.memory_space<vmem>>, %arg8: memref<128x128xbf16, #tpu.memory_space<vmem>>, %arg9: memref<1x128xf32, #tpu.memory_space<vmem>>, %arg10: memref<128x128xbf16, #tpu.memory_space<vmem>>, %arg11: memref<1x128xf32, #tpu.memory_space<vmem>>, %arg12: memref<1x128xbf16, #tpu.memory_space<vmem>>, %arg13: memref<1x1xf32, #tpu.memory_space<smem>>, %arg14: memref<1x512xf32, #tpu.memory_space<vmem>>) attributes {dimension_semantics = [#tpu.dimension_semantics<parallel>], iteration_bounds = array<i64: 1>, scalar_prefetch = 0 : i64, scratch_operands = 0 : i64, tpu.core_type = #tpu.core_type<tc>, window_params = [{transform_indices = @transform_0, window_bounds = array<i64: 512, 16>}, {pipeline_mode = #tpu.pipeline_mode<synchronous>, transform_indices = @transform_1, window_bounds = array<i64: 16, 128>}, {pipeline_mode = #tpu.pipeline_mode<synchronous>, transform_indices = @transform_2, window_bounds = array<i64: 1, 128>}, {pipeline_mode = #tpu.pipeline_mode<synchronous>, transform_indices = @transform_3, window_bounds = array<i64: 128, 128>}, {pipeline_mode = #tpu.pipeline_mode<synchronous>, transform_indices = @transform_4, window_bounds = array<i64: 1, 128>}, {pipeline_mode = #tpu.pipeline_mode<synchronous>, transform_indices = @transform_5, window_bounds = array<i64: 128, 128>}, {pipeline_mode = #tpu.pipeline_mode<synchronous>, transform_indices = @transform_6, window_bounds = array<i64: 1, 128>}, {pipeline_mode = #tpu.pipeline_mode<synchronous>, transform_indices = @transform_7, window_bounds = array<i64: 128, 128>}, {pipeline_mode = #tpu.pipeline_mode<synchronous>, transform_indices = @transform_8, window_bounds = array<i64: 1, 128>}, {pipeline_mode = #tpu.pipeline_mode<synchronous>, transform_indices = @transform_9, window_bounds = array<i64: 128, 128>}, {pipeline_mode = #tpu.pipeline_mode<synchronous>, transform_indices = @transform_10, window_bounds = array<i64: 1, 128>}, {pipeline_mode = #tpu.pipeline_mode<synchronous>, transform_indices = @transform_11, window_bounds = array<i64: 1, 128>}, {transform_indices = @transform_12, window_bounds = array<i64: 1, 1>}, {transform_indices = @transform_13, window_bounds = array<i64: 1, 512>}]} {
    %c0 = arith.constant 0 : index
    %c0_0 = arith.constant 0 : index
    %0 = vector.load %arg1[%c0, %c0_0] : memref<512x16xbf16, #tpu.memory_space<vmem>>, vector<512x16xbf16>
    %c0_1 = arith.constant 0 : index
    %c0_2 = arith.constant 0 : index
    %1 = vector.load %arg2[%c0_1, %c0_2] : memref<16x128xbf16, #tpu.memory_space<vmem>>, vector<16x128xbf16>
    %cst = arith.constant dense<0.000000e+00> : vector<512x128xf32>
    %2 = tpu.matmul %0, %1, %cst {dimension_numbers = #tpu.dot_dimension_numbers<[1], [0], [0], [1], [0, 0, 1, 1], [], []>} : vector<512x16xbf16>, vector<16x128xbf16>, vector<512x128xf32> -> vector<512x128xf32>
    %c0_3 = arith.constant 0 : index
    %c0_4 = arith.constant 0 : index
    %3 = vector.load %arg3[%c0_3, %c0_4] : memref<1x128xf32, #tpu.memory_space<vmem>>, vector<1x128xf32>
    %4 = vector.broadcast %3 : vector<1x128xf32> to vector<512x128xf32>
    %5 = arith.addf %2, %4 : vector<512x128xf32>
    %cst_5 = arith.constant 0.000000e+00 : f32
    %6 = vector.broadcast %cst_5 : f32 to vector<512x128xf32>
    %7 = arith.maximumf %5, %6 : vector<512x128xf32>
    %8 = arith.truncf %7 : vector<512x128xf32> to vector<512x128xbf16>
    %c0_6 = arith.constant 0 : index
    %c0_7 = arith.constant 0 : index
    %9 = vector.load %arg4[%c0_6, %c0_7] : memref<128x128xbf16, #tpu.memory_space<vmem>>, vector<128x128xbf16>
    %cst_8 = arith.constant dense<0.000000e+00> : vector<512x128xf32>
    %10 = tpu.matmul %8, %9, %cst_8 {dimension_numbers = #tpu.dot_dimension_numbers<[1], [0], [0], [1], [0, 0, 1, 1], [], []>} : vector<512x128xbf16>, vector<128x128xbf16>, vector<512x128xf32> -> vector<512x128xf32>
    %c0_9 = arith.constant 0 : index
    %c0_10 = arith.constant 0 : index
    %11 = vector.load %arg5[%c0_9, %c0_10] : memref<1x128xf32, #tpu.memory_space<vmem>>, vector<1x128xf32>
    %12 = vector.broadcast %11 : vector<1x128xf32> to vector<512x128xf32>
    %13 = arith.addf %10, %12 : vector<512x128xf32>
    %cst_11 = arith.constant 0.000000e+00 : f32
    %14 = vector.broadcast %cst_11 : f32 to vector<512x128xf32>
    %15 = arith.maximumf %13, %14 : vector<512x128xf32>
    %16 = arith.truncf %15 : vector<512x128xf32> to vector<512x128xbf16>
    %c0_12 = arith.constant 0 : index
    %c0_13 = arith.constant 0 : index
    %17 = vector.load %arg6[%c0_12, %c0_13] : memref<128x128xbf16, #tpu.memory_space<vmem>>, vector<128x128xbf16>
    %cst_14 = arith.constant dense<0.000000e+00> : vector<512x128xf32>
    %18 = tpu.matmul %16, %17, %cst_14 {dimension_numbers = #tpu.dot_dimension_numbers<[1], [0], [0], [1], [0, 0, 1, 1], [], []>} : vector<512x128xbf16>, vector<128x128xbf16>, vector<512x128xf32> -> vector<512x128xf32>
    %c0_15 = arith.constant 0 : index
    %c0_16 = arith.constant 0 : index
    %19 = vector.load %arg7[%c0_15, %c0_16] : memref<1x128xf32, #tpu.memory_space<vmem>>, vector<1x128xf32>
    %20 = vector.broadcast %19 : vector<1x128xf32> to vector<512x128xf32>
    %21 = arith.addf %18, %20 : vector<512x128xf32>
    %cst_17 = arith.constant 0.000000e+00 : f32
    %22 = vector.broadcast %cst_17 : f32 to vector<512x128xf32>
    %23 = arith.maximumf %21, %22 : vector<512x128xf32>
    %24 = arith.truncf %23 : vector<512x128xf32> to vector<512x128xbf16>
    %c0_18 = arith.constant 0 : index
    %c0_19 = arith.constant 0 : index
    %25 = vector.load %arg8[%c0_18, %c0_19] : memref<128x128xbf16, #tpu.memory_space<vmem>>, vector<128x128xbf16>
    %cst_20 = arith.constant dense<0.000000e+00> : vector<512x128xf32>
    %26 = tpu.matmul %24, %25, %cst_20 {dimension_numbers = #tpu.dot_dimension_numbers<[1], [0], [0], [1], [0, 0, 1, 1], [], []>} : vector<512x128xbf16>, vector<128x128xbf16>, vector<512x128xf32> -> vector<512x128xf32>
    %c0_21 = arith.constant 0 : index
    %c0_22 = arith.constant 0 : index
    %27 = vector.load %arg9[%c0_21, %c0_22] : memref<1x128xf32, #tpu.memory_space<vmem>>, vector<1x128xf32>
    %28 = vector.broadcast %27 : vector<1x128xf32> to vector<512x128xf32>
    %29 = arith.addf %26, %28 : vector<512x128xf32>
    %cst_23 = arith.constant 0.000000e+00 : f32
    %30 = vector.broadcast %cst_23 : f32 to vector<512x128xf32>
    %31 = arith.maximumf %29, %30 : vector<512x128xf32>
    %32 = arith.truncf %31 : vector<512x128xf32> to vector<512x128xbf16>
    %c0_24 = arith.constant 0 : index
    %c0_25 = arith.constant 0 : index
    %33 = vector.load %arg10[%c0_24, %c0_25] : memref<128x128xbf16, #tpu.memory_space<vmem>>, vector<128x128xbf16>
    %cst_26 = arith.constant dense<0.000000e+00> : vector<512x128xf32>
    %34 = tpu.matmul %32, %33, %cst_26 {dimension_numbers = #tpu.dot_dimension_numbers<[1], [0], [0], [1], [0, 0, 1, 1], [], []>} : vector<512x128xbf16>, vector<128x128xbf16>, vector<512x128xf32> -> vector<512x128xf32>
    %c0_27 = arith.constant 0 : index
    %c0_28 = arith.constant 0 : index
    %35 = vector.load %arg11[%c0_27, %c0_28] : memref<1x128xf32, #tpu.memory_space<vmem>>, vector<1x128xf32>
    %36 = vector.broadcast %35 : vector<1x128xf32> to vector<512x128xf32>
    %37 = arith.addf %34, %36 : vector<512x128xf32>
    %cst_29 = arith.constant 0.000000e+00 : f32
    %38 = vector.broadcast %cst_29 : f32 to vector<512x128xf32>
    %39 = arith.maximumf %37, %38 : vector<512x128xf32>
    %40 = arith.truncf %39 : vector<512x128xf32> to vector<512x128xbf16>
    %c0_30 = arith.constant 0 : index
    %c0_31 = arith.constant 0 : index
    %41 = vector.load %arg12[%c0_30, %c0_31] : memref<1x128xbf16, #tpu.memory_space<vmem>>, vector<1x128xbf16>
    %cst_32 = arith.constant dense<0.000000e+00> : vector<1x512xf32>
    %42 = tpu.matmul %41, %40, %cst_32 {dimension_numbers = #tpu.dot_dimension_numbers<[1], [1], [0], [0], [0, 0, 1, 0], [], []>} : vector<1x128xbf16>, vector<512x128xbf16>, vector<1x512xf32> -> vector<1x512xf32>
    %c0_33 = arith.constant 0 : index
    %c0_34 = arith.constant 0 : index
    %43 = memref.load %arg13[%c0_33, %c0_34] : memref<1x1xf32, #tpu.memory_space<smem>>
    %44 = vector.broadcast %43 : f32 to vector<1x512xf32>
    %45 = arith.addf %42, %44 : vector<1x512xf32>
    %c0_35 = arith.constant 0 : index
    %c0_36 = arith.constant 0 : index
    %46 = vector.load %arg14[%c0_35, %c0_36] : memref<1x512xf32, #tpu.memory_space<vmem>>, vector<1x512xf32>
    tpu.vector_store %arg14[%c0_35, %c0_36], %45 {strides = array<i32>} : memref<1x512xf32, #tpu.memory_space<vmem>>, vector<1x512xf32>,
    return
  }
  func.func @transform_0(%arg0: i32) -> (i32, i32) {
    %c0_i32 = arith.constant 0 : i32
    %c0_i32_0 = arith.constant 0 : i32
    return %arg0, %c0_i32 : i32, i32
  }
  func.func @transform_1(%arg0: i32) -> (i32, i32) {
    %c0_i32 = arith.constant 0 : i32
    %c0_i32_0 = arith.constant 0 : i32
    %c0_i32_1 = arith.constant 0 : i32
    return %c0_i32, %c0_i32_0 : i32, i32
  }
  func.func @transform_2(%arg0: i32) -> (i32, i32) {
    %c0_i32 = arith.constant 0 : i32
    %c0_i32_0 = arith.constant 0 : i32
    %c0_i32_1 = arith.constant 0 : i32
    return %c0_i32, %c0_i32_0 : i32, i32
  }
  func.func @transform_3(%arg0: i32) -> (i32, i32) {
    %c0_i32 = arith.constant 0 : i32
    %c0_i32_0 = arith.constant 0 : i32
    %c0_i32_1 = arith.constant 0 : i32
    return %c0_i32, %c0_i32_0 : i32, i32
  }
  func.func @transform_4(%arg0: i32) -> (i32, i32) {
    %c0_i32 = arith.constant 0 : i32
    %c0_i32_0 = arith.constant 0 : i32
    %c0_i32_1 = arith.constant 0 : i32
    return %c0_i32, %c0_i32_0 : i32, i32
  }
  func.func @transform_5(%arg0: i32) -> (i32, i32) {
    %c0_i32 = arith.constant 0 : i32
    %c0_i32_0 = arith.constant 0 : i32
    %c0_i32_1 = arith.constant 0 : i32
    return %c0_i32, %c0_i32_0 : i32, i32
  }
  func.func @transform_6(%arg0: i32) -> (i32, i32) {
    %c0_i32 = arith.constant 0 : i32
    %c0_i32_0 = arith.constant 0 : i32
    %c0_i32_1 = arith.constant 0 : i32
    return %c0_i32, %c0_i32_0 : i32, i32
  }
  func.func @transform_7(%arg0: i32) -> (i32, i32) {
    %c0_i32 = arith.constant 0 : i32
    %c0_i32_0 = arith.constant 0 : i32
    %c0_i32_1 = arith.constant 0 : i32
    return %c0_i32, %c0_i32_0 : i32, i32
  }
  func.func @transform_8(%arg0: i32) -> (i32, i32) {
    %c0_i32 = arith.constant 0 : i32
    %c0_i32_0 = arith.constant 0 : i32
    %c0_i32_1 = arith.constant 0 : i32
    return %c0_i32, %c0_i32_0 : i32, i32
  }
  func.func @transform_9(%arg0: i32) -> (i32, i32) {
    %c0_i32 = arith.constant 0 : i32
    %c0_i32_0 = arith.constant 0 : i32
    %c0_i32_1 = arith.constant 0 : i32
    return %c0_i32, %c0_i32_0 : i32, i32
  }
  func.func @transform_10(%arg0: i32) -> (i32, i32) {
    %c0_i32 = arith.constant 0 : i32
    %c0_i32_0 = arith.constant 0 : i32
    %c0_i32_1 = arith.constant 0 : i32
    return %c0_i32, %c0_i32_0 : i32, i32
  }
  func.func @transform_11(%arg0: i32) -> (i32, i32) {
    %c0_i32 = arith.constant 0 : i32
    %c0_i32_0 = arith.constant 0 : i32
    %c0_i32_1 = arith.constant 0 : i32
    return %c0_i32, %c0_i32_0 : i32, i32
  }
  func.func @transform_12(%arg0: i32) -> (i32, i32) {
    %c0_i32 = arith.constant 0 : i32
    %c0_i32_0 = arith.constant 0 : i32
    %c0_i32_1 = arith.constant 0 : i32
    return %c0_i32, %c0_i32_0 : i32, i32
  }
  func.func @transform_13(%arg0: i32) -> (i32, i32) {
    %c0_i32 = arith.constant 0 : i32
    %c0_i32_0 = arith.constant 0 : i32
    return %c0_i32, %arg0 : i32, i32
  }
}

</mosaic_0001>

<bundles_post_ra>
// kernel: _deepnet_forward_impl.1
= control target key start
LH: loop header
LB: loop body
LE: loop exit
PB: predicated region body
PF: predicated region fallthrough
CT: control target
= control target key end

     0   :  { %vm283_vm0 = vcmask 130048   ;;  %s3312_s0 = inlined_call_operand.vmem [shape: bf16[512,16], index: 0, kind: input, shape index: {}]   ;;  %s3313_s1 = inlined_call_operand.vmem [shape: bf16[16,128], index: 1, kind: input, shape index: {}]   ;;  %s3314_s2 = inlined_call_operand.vmem [shape: f32[1,128], index: 2, kind: input, shape index: {}]   ;;  %s3315_s3 = inlined_call_operand.vmem [shape: bf16[128,128], index: 3, kind: input, shape index: {}]   ;;  %s3316_s4 = inlined_call_operand.vmem [shape: f32[1,128], index: 4, kind: input, shape index: {}]   ;;  %s3317_s5 = inlined_call_operand.vmem [shape: bf16[128,128], index: 5, kind: input, shape index: {}]   ;;  %s3318_s6 = inlined_call_operand.vmem [shape: f32[1,128], index: 6, kind: input, shape index: {}]   ;;  %s3319_s7 = inlined_call_operand.vmem [shape: bf16[128,128], index: 7, kind: input, shape index: {}]   ;;  %s3320_s8 = inlined_call_operand.vmem [shape: f32[1,128], index: 8, kind: input, shape index: {}]   ;;  %s3321_s9 = inlined_call_operand.vmem [shape: bf16[128,128], index: 9, kind: input, shape index: {}]   ;;  %s3322_s10 = inlined_call_operand.vmem [shape: f32[1,128], index: 10, kind: input, shape index: {}]   ;;  %s3323_s11 = inlined_call_operand.vmem [shape: bf16[1,128], index: 11, kind: input, shape index: {}]   ;;  %s3324_s12 = inlined_call_operand.<no memory space> [shape: f32[1,1], index: 12, kind: input, shape index: {}]   ;;  %s3325_s13 = inlined_call_operand.hbm [shape: f32[1,512], index: 13, kind: output, shape index: {}]  }
   0x1   :  { %v2391_v0 = vld [vmem:[%s3313_s1] sm:$0xff] }
   0x2   :  { %v2359_v1 = vld [vmem:[%s3312_s0] sm:$0xff]  ;;  %387 = vmatpush.bf16.msra.mxu0 %v2391_v0  ;;  %2424 = vmatpush.bf16.msra.mxu1 %v2391_v0 }
   0x3   :  { %2425 = vmatpush.bf16.msra.mxu2 %v2391_v0  ;;  %2426 = vmatpush.bf16.msra.mxu3 %v2391_v0 }
   0x4   :  { %19 = vsyncpa [#allocation4], 0  ;;  %v2360_v2 = vld [vmem:[%s3312_s0 + $0x8] sm:$0xff]  ;;  %v2361_v3 = vld [vmem:[%s3312_s0 + $0x10] sm:$0xff]  ;;  %vm2039_vm1 = vcmask 1040384   ;;  %vm2041_vm2 = vcmask 1042434  }
   0x5   :  { %2199 = vmatmul.msk.bf16.vlgmr.msra.gmra.mxu0 %vm283_vm0, %v2359_v1  ;;  %v2362_v4 = vld [vmem:[%s3312_s0 + $0x18] sm:$0xff]  ;;  %v2363_v5 = vld [vmem:[%s3312_s0 + $0x20] sm:$0xff]  ;;  %v2364_v8 = vld [vmem:[%s3312_s0 + $0x28] sm:$0xff]  ;;  %s2464_s16 = smov [#allocation3]   ;;  %s2058_s18 = sshll.u32 %s3325_s13, 4  ;;  %vm2043_vm3 = vcmask 1041408   ;;  %s2059_s18 = int_to_ptr.hbm [resolvable:$true] %s2058_s18 }
   0x6   :  { %v2370_v6 = vld [vmem:[%s3312_s0 + $0x58] sm:$0xff]  ;;  %v2372_v9 = vld [vmem:[%s3312_s0 + $0x68] sm:$0xff]  ;;  %v2398_v10 = vld [vmem:[%s3315_s3 + $0x30] sm:$0xff]  ;;  %s2056_s17 = sshll.u32 %s2464_s16, 4  ;;  %s2057_s17 = int_to_ptr.vmem [resolvable:$true] %s2056_s17 }
   0x7   :  { %v2399_v7 = vld [vmem:[%s3315_s3 + $0x38] sm:$0xff]  ;;  %2210 = vmatmul.msk.bf16.vlgmr.msra.gmra.mxu1 %vm283_vm0, %v2370_v6  ;;  %2212 = vmatmul.msk.bf16.vlgmr.msra.gmra.mxu2 %vm283_vm0, %v2372_v9  ;;  %v2371_v11 = vld [vmem:[%s3312_s0 + $0x60] sm:$0xff]  ;;  %v2397_v12 = vld [vmem:[%s3315_s3 + $0x28] sm:$0xff] }
   0x8   :  { %713 = vmatpush.bf16.msrb.mxu1 %v2399_v7  ;;  %v2396_v13 = vld [vmem:[%s3315_s3 + $0x20] sm:$0xff]  ;;  %v2395_v14 = vld [vmem:[%s3315_s3 + $0x18] sm:$0xff]  ;;  %v2365_v15 = vld [vmem:[%s3312_s0 + $0x30] sm:$0xff] }
   0x9   :  { %v2373_v16 = vld [vmem:[%s3312_s0 + $0x70] sm:$0xff]  ;;  %v2393_v18 = vld [vmem:[%s3315_s3 + $0x8] sm:$0xff]  ;;  %v2392_v19 = vld [vmem:[%s3315_s3] sm:$0xff] }
   0xa   :  { %v2394_v17 = vld [vmem:[%s3315_s3 + $0x10] sm:$0xff]  ;;  %v2366_v20 = vld [vmem:[%s3312_s0 + $0x38] sm:$0xff]  ;;  %v2367_v22 = vld [vmem:[%s3312_s0 + $0x40] sm:$0xff] }
   0xb   :  { %v2374_v21 = vld [vmem:[%s3312_s0 + $0x78] sm:$0xff]  ;;  %v2375_v24 = vld [vmem:[%s3312_s0 + $0x80] sm:$0xff]  ;;  %v2368_v32 = vld [vmem:[%s3312_s0 + $0x48] sm:$0xff] }
   0xc   :  { %714 = vmatpush.bf16.msrb.mxu1 %v2398_v10  ;;  %v2623_v25 = vld [vmem:[%s3314_s2] ss:$0 sm:$0xff]  ;;  %v2376_v34 = vld [vmem:[%s3312_s0 + $0x88] sm:$0xff]  ;;  %v2369_v41 = vld [vmem:[%s3312_s0 + $0x50] sm:$0xff] }
   0xd   :  { %v2377_v43 = vld [vmem:[%s3312_s0 + $0x90] sm:$0xff]  ;;  %v2378_v51 = vld [vmem:[%s3312_s0 + $0x98] sm:$0xff]  ;;  %v2379_v59 = vld [vmem:[%s3312_s0 + $0xa0] sm:$0xff] }
   0xe   :  { %v2380_v9 = vld [vmem:[%s3312_s0 + $0xa8] sm:$0xff] }
  0x10   :  { %715 = vmatpush.bf16.msrb.mxu1 %v2397_v12 }
  0x14   :  { %716 = vmatpush.bf16.msrb.mxu1 %v2396_v13 }
  0x15   :  { %2200 = vmatmul.msk.bf16.gmra.mxu0 %vm283_vm0, %v2360_v2 }
  0x17   :  { %2211 = vmatmul.msk.bf16.gmra.mxu1 %vm283_vm0, %v2371_v11  ;;  %2213 = vmatmul.msk.bf16.gmra.mxu2 %vm283_vm0, %v2373_v16 }
  0x18   :  { %717 = vmatpush.bf16.msrb.mxu1 %v2395_v14 }
  0x1c   :  { %718 = vmatpush.bf16.msrb.mxu1 %v2394_v17  ;;  %v2407_v17 = vld [vmem:[%s3317_s5 + $0x38] sm:$0xff] }
  0x1d   :  { %1046 = vmatpush.bf16.msrb.mxu2 %v2407_v17 }
  0x20   :  { %719 = vmatpush.bf16.msrb.mxu1 %v2393_v18 }
  0x24   :  { %720 = vmatpush.bf16.msrb.mxu1 %v2392_v19 }
  0x25   :  { %2201 = vmatmul.msk.bf16.gmra.mxu0 %vm283_vm0, %v2361_v3 }
  0x27   :  { %2214 = vmatmul.msk.bf16.gmra.mxu2 %vm283_vm0, %v2374_v21 }
  0x35   :  { %2202 = vmatmul.msk.bf16.gmra.mxu0 %vm283_vm0, %v2362_v4 }
  0x37   :  { %2215 = vmatmul.msk.bf16.gmra.mxu2 %vm283_vm0, %v2375_v24 }
  0x45   :  { %2203 = vmatmul.msk.bf16.gmra.mxu0 %vm283_vm0, %v2363_v5 }
  0x47   :  { %2216 = vmatmul.msk.bf16.gmra.mxu2 %vm283_vm0, %v2376_v34 }
  0x55   :  { %2204 = vmatmul.msk.bf16.gmra.mxu0 %vm283_vm0, %v2364_v8 }
  0x57   :  { %2217 = vmatmul.msk.bf16.gmra.mxu2 %vm283_vm0, %v2377_v43  ;;  %v2401_v43 = vld [vmem:[%s3317_s5 + $0x8] sm:$0xff] }
  0x65   :  { %2205 = vmatmul.msk.bf16.gmra.mxu0 %vm283_vm0, %v2365_v15 }
  0x67   :  { %2218 = vmatmul.msk.bf16.gmra.mxu2 %vm283_vm0, %v2378_v51 }
  0x75   :  { %2206 = vmatmul.msk.bf16.gmra.mxu0 %vm283_vm0, %v2366_v20 }
  0x77   :  { %2219 = vmatmul.msk.bf16.gmra.mxu2 %vm283_vm0, %v2379_v59 }
  0x82   :  { %v389_v23 = vpop.f32.mrf.mxu0 }
  0x83   :  { %v390_v26 = vadd.f32 %v2623_v25, %v389_v23 }
  0x84   :  { %v444_v60 = vpop.f32.mrf.mxu1 }
  0x85   :  { %2207 = vmatmul.msk.bf16.gmra.mxu0 %vm283_vm0, %v2367_v22  ;;  %v549_v29 = vmax.f32 %v390_v26, 0.0  ;;  %v445_v0 = vadd.f32 %v2623_v25, %v444_v60  ;;  %v2406_v26 = vld [vmem:[%s3317_s5 + $0x30] sm:$0xff] }
  0x86   :  { %1047 = vmatpush.bf16.msrb.mxu2 %v2406_v26 }
  0x87   :  { %v571_v6 = vmax.f32 %v445_v0, 0.0  ;;  %2220 = vmatmul.msk.bf16.gmra.mxu2 %vm283_vm0, %v2380_v9  ;;  %v2732_v0 = vld [vmem:[%s3316_s4] ss:$0 sm:$0xff] }
  0x8a   :  { %v391_v27 = vpop.f32.mrf.mxu0  ;;  %v2670_v14 = vpop.f32.mrf.mxu2 }
  0x8b   :  { %v392_v28 = vadd.f32 %v2623_v25, %v391_v27 }
  0x8c   :  { %v446_v3 = vpop.f32.mrf.mxu1 }
  0x8d   :  { %v550_v30 = vmax.f32 %v392_v28, 0.0  ;;  %v447_v4 = vadd.f32 %v2623_v25, %v446_v3  ;;  %v2381_v28 = vld [vmem:[%s3312_s0 + $0xb0] sm:$0xff]  ;;  %v2384_v3 = vld [vmem:[%s3312_s0 + $0xc8] sm:$0xff] }
  0x8f   :  { %v613_v31 = vpack.c.bf16 %v550_v30, %v549_v29  ;;  %v572_v7 = vmax.f32 %v447_v4, 0.0 }
  0x91   :  { %721 = vmatmul.bf16.vlgmr.msrb.gmra.mxu1 %v613_v31  ;;  %v2666_v10 = vpack.c.bf16 %v572_v7, %v571_v6  ;;  %v2405_v31 = vld [vmem:[%s3317_s5 + $0x28] sm:$0xff] }
  0x92   :  { %v394_v33 = vpop.f32.mrf.mxu0  ;;  %v2686_v30 = vpop.f32.mrf.mxu2  ;;  %1048 = vmatpush.bf16.msrb.mxu2 %v2405_v31 }
  0x93   :  { %v395_v35 = vadd.f32 %v2623_v25, %v394_v33 }
  0x94   :  { %v449_v11 = vpop.f32.mrf.mxu1 }
  0x95   :  { %2208 = vmatmul.msk.bf16.gmra.mxu0 %vm283_vm0, %v2368_v32  ;;  %v551_v38 = vmax.f32 %v395_v35, 0.0  ;;  %v450_v16 = vadd.f32 %v2623_v25, %v449_v11  ;;  %v2404_v32 = vld [vmem:[%s3317_s5 + $0x20] sm:$0xff] }
  0x96   :  { %1049 = vmatpush.bf16.msrb.mxu2 %v2404_v32 }
  0x97   :  { %v573_v23 = vmax.f32 %v450_v16, 0.0  ;;  %2221 = vmatmul.msk.bf16.gmra.mxu2 %vm283_vm0, %v2381_v28 }
  0x9a   :  { %v396_v36 = vpop.f32.mrf.mxu0 }
  0x9b   :  { %v397_v37 = vadd.f32 %v2623_v25, %v396_v36  ;;  %v2403_v36 = vld [vmem:[%s3317_s5 + $0x18] sm:$0xff] }
  0x9c   :  { %v451_v20 = vpop.f32.mrf.mxu1  ;;  %1050 = vmatpush.bf16.msrb.mxu2 %v2403_v36 }
  0x9d   :  { %v552_v39 = vmax.f32 %v397_v37, 0.0  ;;  %v452_v21 = vadd.f32 %v2623_v25, %v451_v20 }
  0x9f   :  { %v614_v40 = vpack.c.bf16 %v552_v39, %v551_v38  ;;  %v574_v24 = vmax.f32 %v452_v21, 0.0  ;;  %v2700_v39 = vpop.f32.mrf.mxu2 }
  0xa1   :  { %726 = vmatmul.bf16.gmra.mxu1 %v614_v40  ;;  %v2684_v29 = vpack.c.bf16 %v574_v24, %v573_v23 }
  0xa2   :  { %v399_v42 = vpop.f32.mrf.mxu0 }
  0xa3   :  { %v400_v44 = vadd.f32 %v2623_v25, %v399_v42 }
  0xa5   :  { %2209 = vmatmul.msk.bf16.gmra.mxu0 %vm283_vm0, %v2369_v41  ;;  %v553_v47 = vmax.f32 %v400_v44, 0.0  ;;  %v2402_v41 = vld [vmem:[%s3317_s5 + $0x10] sm:$0xff]  ;;  %v2382_v44 = vld [vmem:[%s3312_s0 + $0xb8] sm:$0xff] }
  0xa6   :  { %1051 = vmatpush.bf16.msrb.mxu2 %v2402_v41  ;;  %2222 = vmatmul.msk.bf16.vlgmr.msra.gmra.mxu3 %vm283_vm0, %v2382_v44 }
  0xaa   :  { %v401_v45 = vpop.f32.mrf.mxu0  ;;  %1052 = vmatpush.bf16.msrb.mxu2 %v2401_v43 }
  0xab   :  { %v402_v46 = vadd.f32 %v2623_v25, %v401_v45  ;;  %v2712_v45 = vpop.f32.mrf.mxu2 }
  0xad   :  { %v554_v48 = vmax.f32 %v402_v46, 0.0  ;;  %v2400_v46 = vld [vmem:[%s3317_s5] sm:$0xff] }
  0xae   :  { %1053 = vmatpush.bf16.msrb.mxu2 %v2400_v46 }
  0xaf   :  { %v615_v49 = vpack.c.bf16 %v554_v48, %v553_v47 }
  0xb1   :  { %731 = vmatmul.bf16.gmra.mxu1 %v615_v49 }
  0xb2   :  { %v404_v50 = vpop.f32.mrf.mxu0 }
  0xb3   :  { %v405_v52 = vadd.f32 %v2623_v25, %v404_v50 }
  0xb5   :  { %v555_v55 = vmax.f32 %v405_v52, 0.0 }
  0xba   :  { %v406_v53 = vpop.f32.mrf.mxu0 }
  0xbb   :  { %v407_v54 = vadd.f32 %v2623_v25, %v406_v53 }
  0xbd   :  { %v556_v56 = vmax.f32 %v407_v54, 0.0  ;;  %v2719_v54 = vpop.f32.mrf.mxu2 }
  0xbf   :  { %v616_v57 = vpack.c.bf16 %v556_v56, %v555_v55  ;;  %v2383_v55 = vld [vmem:[%s3312_s0 + $0xc0] sm:$0xff] }
  0xc0   :  { %2223 = vmatmul.msk.bf16.gmra.mxu3 %vm283_vm0, %v2383_v55 }
  0xc1   :  { %736 = vmatmul.bf16.gmra.mxu1 %v616_v57 }
  0xc2   :  { %v409_v58 = vpop.f32.mrf.mxu0 }
  0xc3   :  { %v410_v61 = vadd.f32 %v2623_v25, %v409_v58 }
  0xc5   :  { %v557_v1 = vmax.f32 %v410_v61, 0.0  ;;  %v2727_v59 = vpop.f32.mrf.mxu2 }
  0xca   :  { %v411_v62 = vpop.f32.mrf.mxu0 }
  0xcb   :  { %v412_v63 = vadd.f32 %v2623_v25, %v411_v62 }
  0xcd   :  { %v558_v2 = vmax.f32 %v412_v63, 0.0 }
  0xcf   :  { %v617_v5 = vpack.c.bf16 %v558_v2, %v557_v1 }
  0xd0   :  { %2224 = vmatmul.msk.bf16.gmra.mxu3 %vm283_vm0, %v2384_v3  ;;  %v457_v3 = vadd.f32 %v2623_v25, %v2686_v30  ;;  %v2389_v30 = vld [vmem:[%s3312_s0 + $0xf0] sm:$0xff] }
  0xd1   :  { %741 = vmatmul.bf16.gmra.mxu1 %v617_v5  ;;  %v2738_v5 = vpop.f32.mrf.mxu2 }
  0xd2   :  { %v414_v8 = vpop.f32.mrf.mxu0 }
  0xd3   :  { %v415_v12 = vadd.f32 %v2623_v25, %v414_v8 }
  0xd5   :  { %v559_v18 = vmax.f32 %v415_v12, 0.0 }
  0xda   :  { %v416_v13 = vpop.f32.mrf.mxu0 }
  0xdb   :  { %v417_v15 = vadd.f32 %v2623_v25, %v416_v13 }
  0xdd   :  { %v560_v19 = vmax.f32 %v417_v15, 0.0 }
  0xdf   :  { %v618_v22 = vpack.c.bf16 %v560_v19, %v559_v18  ;;  %v2744_v19 = vpop.f32.mrf.mxu2 }
  0xe1   :  { %746 = vmatmul.bf16.gmra.mxu1 %v618_v22  ;;  %v2385_v22 = vld [vmem:[%s3312_s0 + $0xd0] sm:$0xff] }
  0xe2   :  { %v419_v27 = vpop.f32.mrf.mxu0  ;;  %2225 = vmatmul.msk.bf16.gmra.mxu3 %vm283_vm0, %v2385_v22 }
  0xe3   :  { %v420_v33 = vadd.f32 %v2623_v25, %v419_v27 }
  0xe5   :  { %v561_v37 = vmax.f32 %v420_v33, 0.0 }
  0xe7   :  { %v2753_v32 = vpop.f32.mrf.mxu2 }
  0xea   :  { %v421_v34 = vpop.f32.mrf.mxu0 }
  0xeb   :  { %v422_v35 = vadd.f32 %v2623_v25, %v421_v34 }
  0xed   :  { %v562_v38 = vmax.f32 %v422_v35, 0.0 }
  0xef   :  { %v619_v40 = vpack.c.bf16 %v562_v38, %v561_v37 }
  0xf1   :  { %751 = vmatmul.bf16.gmra.mxu1 %v619_v40  ;;  %v2756_v40 = vpop.f32.mrf.mxu2 }
  0xf2   :  { %v424_v42 = vpop.f32.mrf.mxu0 }
  0xf3   :  { %v425_v47 = vadd.f32 %v2623_v25, %v424_v42  ;;  %v2386_v42 = vld [vmem:[%s3312_s0 + $0xd8] sm:$0xff] }
  0xf4   :  { %2226 = vmatmul.msk.bf16.gmra.mxu3 %vm283_vm0, %v2386_v42 }
  0xf5   :  { %v563_v50 = vmax.f32 %v425_v47, 0.0 }
  0xfa   :  { %v426_v48 = vpop.f32.mrf.mxu0 }
  0xfb   :  { %v427_v49 = vadd.f32 %v2623_v25, %v426_v48 }
  0xfd   :  { %v564_v51 = vmax.f32 %v427_v49, 0.0 }
  0xff   :  { %v620_v52 = vpack.c.bf16 %v564_v51, %v563_v50  ;;  %v2764_v50 = vpop.f32.mrf.mxu2 }
 0x101   :  { %756 = vmatmul.bf16.gmra.mxu1 %v620_v52  ;;  %v2387_v52 = vld [vmem:[%s3312_s0 + $0xe0] sm:$0xff] }
 0x102   :  { %v429_v53 = vpop.f32.mrf.mxu0 }
 0x103   :  { %v430_v56 = vadd.f32 %v2623_v25, %v429_v53 }
 0x104   :  { %2227 = vmatmul.msk.bf16.gmra.mxu3 %vm283_vm0, %v2387_v52 }
 0x105   :  { %v565_v60 = vmax.f32 %v430_v56, 0.0 }
 0x107   :  { %v2773_v56 = vpop.f32.mrf.mxu2 }
 0x10a   :  { %v431_v57 = vpop.f32.mrf.mxu0 }
 0x10b   :  { %v432_v58 = vadd.f32 %v2623_v25, %v431_v57 }
 0x10d   :  { %v566_v61 = vmax.f32 %v432_v58, 0.0 }
 0x10e   :  { %v722_v62 = vpop.f32.mrf.mxu1 }
 0x10f   :  { %v621_v63 = vpack.c.bf16 %v566_v61, %v565_v60  ;;  %v723_v2 = vadd.f32 %v2732_v0, %v722_v62 }
 0x111   :  { %761 = vmatmul.bf16.gmra.mxu1 %v621_v63  ;;  %v882_v7 = vmax.f32 %v723_v2, 0.0  ;;  %v2388_v63 = vld [vmem:[%s3312_s0 + $0xe8] sm:$0xff]  ;;  %v455_v2 = vadd.f32 %v2623_v25, %v2670_v14 }
 0x112   :  { %v434_v1 = vpop.f32.mrf.mxu0 }
 0x113   :  { %v435_v8 = vadd.f32 %v2623_v25, %v434_v1 }
 0x114   :  { %2228 = vmatmul.msk.bf16.gmra.mxu3 %vm283_vm0, %v2388_v63 }
 0x115   :  { %v567_v15 = vmax.f32 %v435_v8, 0.0  ;;  %v576_v8 = vmax.f32 %v457_v3, 0.0 }
 0x116   :  { %v724_v4 = vpop.f32.mrf.mxu1 }
 0x117   :  { %v725_v6 = vadd.f32 %v2732_v0, %v724_v4 }
 0x119   :  { %v883_v9 = vmax.f32 %v725_v6, 0.0 }
 0x11a   :  { %v436_v11 = vpop.f32.mrf.mxu0 }
 0x11b   :  { %v437_v12 = vadd.f32 %v2623_v25, %v436_v11  ;;  %v946_v13 = vpack.c.bf16 %v883_v9, %v882_v7  ;;  %v575_v7 = vmax.f32 %v455_v2, 0.0 }
 0x11d   :  { %v568_v16 = vmax.f32 %v437_v12, 0.0  ;;  %1054 = vmatmul.bf16.vlgmr.msrb.gmra.mxu2 %v946_v13  ;;  %v626_v13 = vpack.c.bf16 %v576_v8, %v575_v7 }
 0x11e   :  { %v727_v17 = vpop.f32.mrf.mxu1 }
 0x11f   :  { %v622_v18 = vpack.c.bf16 %v568_v16, %v567_v15  ;;  %v728_v21 = vadd.f32 %v2732_v0, %v727_v17  ;;  %v460_v17 = vadd.f32 %v2623_v25, %v2700_v39 }
 0x121   :  { %766 = vmatmul.bf16.gmra.mxu1 %v622_v18  ;;  %v884_v26 = vmax.f32 %v728_v21, 0.0  ;;  %v462_v18 = vadd.f32 %v2623_v25, %v2712_v45  ;;  %v2414_v45 = vld [vmem:[%s3319_s7 + $0x30] sm:$0xff] }
 0x122   :  { %v439_v20 = vpop.f32.mrf.mxu0 }
 0x123   :  { %v440_v27 = vadd.f32 %v2623_v25, %v439_v20 }
 0x124   :  { %2229 = vmatmul.msk.bf16.gmra.mxu3 %vm283_vm0, %v2389_v30  ;;  %v477_v30 = vadd.f32 %v2623_v25, %v2756_v40 }
 0x125   :  { %v569_v35 = vmax.f32 %v440_v27, 0.0 }
 0x126   :  { %v729_v23 = vpop.f32.mrf.mxu1 }
 0x127   :  { %v730_v24 = vadd.f32 %v2732_v0, %v729_v23  ;;  %v577_v23 = vmax.f32 %v460_v17, 0.0 }
 0x129   :  { %v885_v28 = vmax.f32 %v730_v24, 0.0  ;;  %v578_v24 = vmax.f32 %v462_v18, 0.0  ;;  %v2831_v52 = vpop.f32.mrf.mxu3 }
 0x12a   :  { %v441_v31 = vpop.f32.mrf.mxu0 }
 0x12b   :  { %v442_v33 = vadd.f32 %v2623_v25, %v441_v31  ;;  %v947_v34 = vpack.c.bf16 %v885_v28, %v884_v26  ;;  %v2415_v28 = vld [vmem:[%s3319_s7 + $0x38] sm:$0xff]  ;;  %v627_v31 = vpack.c.bf16 %v578_v24, %v577_v23 }
 0x12c   :  { %1379 = vmatpush.bf16.msrb.mxu3 %v2415_v28 }
 0x12d   :  { %v570_v36 = vmax.f32 %v442_v33, 0.0  ;;  %1059 = vmatmul.bf16.gmra.mxu2 %v947_v34  ;;  %v2390_v34 = vld [vmem:[%s3312_s0 + $0xf8] sm:$0xff] }
 0x12e   :  { %v732_v37 = vpop.f32.mrf.mxu1 }
 0x12f   :  { %v623_v38 = vpack.c.bf16 %v570_v36, %v569_v35  ;;  %v733_v41 = vadd.f32 %v2732_v0, %v732_v37  ;;  %v2413_v36 = vld [vmem:[%s3319_s7 + $0x28] sm:$0xff]  ;;  %v465_v37 = vadd.f32 %v2623_v25, %v2719_v54 }
 0x130   :  { %1380 = vmatpush.bf16.msrb.mxu3 %v2414_v45 }
 0x131   :  { %771 = vmatmul.bf16.gmra.mxu1 %v623_v38  ;;  %v886_v46 = vmax.f32 %v733_v41, 0.0  ;;  %v467_v38 = vadd.f32 %v2623_v25, %v2727_v59  ;;  %v2411_v59 = vld [vmem:[%s3319_s7 + $0x18] sm:$0xff]  ;;  %v2847_v3 = vpop.f32.mrf.mxu3 }
 0x134   :  { %2230 = vmatmul.msk.bf16.gmra.mxu3 %vm283_vm0, %v2390_v34 }
 0x135   :  { %1381 = vmatpush.bf16.msrb.mxu3 %v2413_v36 }
 0x136   :  { %v734_v43 = vpop.f32.mrf.mxu1 }
 0x137   :  { %v735_v44 = vadd.f32 %v2732_v0, %v734_v43 }
 0x139   :  { %v887_v47 = vmax.f32 %v735_v44, 0.0  ;;  %v2412_v44 = vld [vmem:[%s3319_s7 + $0x20] sm:$0xff] }
 0x13a   :  { %1382 = vmatpush.bf16.msrb.mxu3 %v2412_v44 }
 0x13b   :  { %v948_v48 = vpack.c.bf16 %v887_v47, %v886_v46  ;;  %v579_v47 = vmax.f32 %v465_v37, 0.0 }
 0x13d   :  { %1064 = vmatmul.bf16.gmra.mxu2 %v948_v48  ;;  %v580_v48 = vmax.f32 %v467_v38, 0.0 }
 0x13e   :  { %v737_v49 = vpop.f32.mrf.mxu1  ;;  %1383 = vmatpush.bf16.msrb.mxu3 %v2411_v59 }
 0x13f   :  { %v738_v51 = vadd.f32 %v2732_v0, %v737_v49 }
 0x141   :  { %776 = vmatmul.bf16.gmra.mxu1 %v2666_v10  ;;  %v888_v57 = vmax.f32 %v738_v51, 0.0  ;;  %v2776_v10 = vpop.f32.mrf.mxu2  ;;  %v628_v51 = vpack.c.bf16 %v580_v48, %v579_v47 }
 0x146   :  { %v739_v53 = vpop.f32.mrf.mxu1 }
 0x147   :  { %v740_v55 = vadd.f32 %v2732_v0, %v739_v53  ;;  %v2410_v53 = vld [vmem:[%s3319_s7 + $0x10] sm:$0xff] }
 0x148   :  { %1384 = vmatpush.bf16.msrb.mxu3 %v2410_v53 }
 0x149   :  { %v889_v58 = vmax.f32 %v740_v55, 0.0  ;;  %v2788_v11 = vpop.f32.mrf.mxu2 }
 0x14b   :  { %v949_v60 = vpack.c.bf16 %v889_v58, %v888_v57 }
 0x14d   :  { %1069 = vmatmul.bf16.gmra.mxu2 %v949_v60  ;;  %v2409_v60 = vld [vmem:[%s3319_s7 + $0x8] sm:$0xff] }
 0x14e   :  { %v742_v61 = vpop.f32.mrf.mxu1  ;;  %1385 = vmatpush.bf16.msrb.mxu3 %v2409_v60  ;;  %v487_v60 = vadd.f32 %v2623_v25, %v2788_v11 }
 0x14f   :  { %v743_v62 = vadd.f32 %v2732_v0, %v742_v61  ;;  %v470_v61 = vadd.f32 %v2623_v25, %v2738_v5 }
 0x151   :  { %781 = vmatmul.bf16.gmra.mxu1 %v2684_v29  ;;  %v890_v29 = vmax.f32 %v743_v62, 0.0  ;;  %v2794_v16 = vpop.f32.mrf.mxu2  ;;  %v472_v62 = vadd.f32 %v2623_v25, %v2744_v19 }
 0x156   :  { %v744_v1 = vpop.f32.mrf.mxu1 }
 0x157   :  { %v745_v4 = vadd.f32 %v2732_v0, %v744_v1 }
 0x159   :  { %v891_v6 = vmax.f32 %v745_v4, 0.0  ;;  %v2805_v39 = vpop.f32.mrf.mxu2  ;;  %v2408_v4 = vld [vmem:[%s3319_s7] sm:$0xff] }
 0x15a   :  { %1386 = vmatpush.bf16.msrb.mxu3 %v2408_v4 }
 0x15b   :  { %v950_v9 = vpack.c.bf16 %v891_v6, %v890_v29  ;;  %v581_v29 = vmax.f32 %v470_v61, 0.0  ;;  %v582_v6 = vmax.f32 %v472_v62, 0.0 }
 0x15d   :  { %1074 = vmatmul.bf16.gmra.mxu2 %v950_v9  ;;  %v629_v19 = vpack.c.bf16 %v582_v6, %v581_v29  ;;  %v2854_v9 = vpop.f32.mrf.mxu3  ;;  %v588_v6 = vmax.f32 %v487_v60, 0.0 }
 0x15e   :  { %v747_v12 = vpop.f32.mrf.mxu1 }
 0x15f   :  { %v748_v14 = vadd.f32 %v2732_v0, %v747_v12 }
 0x161   :  { %786 = vmatmul.bf16.gmra.mxu1 %v626_v13  ;;  %v892_v21 = vmax.f32 %v748_v14, 0.0  ;;  %v2826_v46 = vpop.f32.mrf.mxu2  ;;  %v475_v14 = vadd.f32 %v2623_v25, %v2753_v32  ;;  %v2869_v32 = vld [vmem:[%s3318_s6] ss:$0 sm:$0xff] }
 0x166   :  { %v749_v15 = vpop.f32.mrf.mxu1 }
 0x167   :  { %v750_v20 = vadd.f32 %v2732_v0, %v749_v15 }
 0x169   :  { %v893_v22 = vmax.f32 %v750_v20, 0.0  ;;  %v2836_v55 = vpop.f32.mrf.mxu2 }
 0x16b   :  { %v951_v26 = vpack.c.bf16 %v893_v22, %v892_v21  ;;  %v583_v21 = vmax.f32 %v475_v14, 0.0  ;;  %v584_v22 = vmax.f32 %v477_v30, 0.0 }
 0x16d   :  { %1079 = vmatmul.bf16.gmra.mxu2 %v951_v26  ;;  %v2864_v26 = vpop.f32.mrf.mxu3 }
 0x16e   :  { %v752_v27 = vpop.f32.mrf.mxu1 }
 0x16f   :  { %v753_v33 = vadd.f32 %v2732_v0, %v752_v27  ;;  %v630_v27 = vpack.c.bf16 %v584_v22, %v583_v21  ;;  %v492_v21 = vadd.f32 %v2623_v25, %v2805_v39 }
 0x171   :  { %791 = vmatmul.bf16.gmra.mxu1 %v627_v31  ;;  %v894_v42 = vmax.f32 %v753_v33, 0.0  ;;  %v2852_v5 = vpop.f32.mrf.mxu2  ;;  %v480_v31 = vadd.f32 %v2623_v25, %v2764_v50  ;;  %v482_v33 = vadd.f32 %v2623_v25, %v2773_v56 }
 0x173   :  { %v586_v44 = vmax.f32 %v482_v33, 0.0 }
 0x175   :  { %v2878_v37 = vpop.f32.mrf.mxu3 }
 0x176   :  { %v754_v35 = vpop.f32.mrf.mxu1 }
 0x177   :  { %v755_v41 = vadd.f32 %v2732_v0, %v754_v35 }
 0x179   :  { %v895_v43 = vmax.f32 %v755_v41, 0.0  ;;  %v2862_v17 = vpop.f32.mrf.mxu2 }
 0x17b   :  { %v952_v49 = vpack.c.bf16 %v895_v43, %v894_v42  ;;  %v585_v43 = vmax.f32 %v480_v31, 0.0 }
 0x17d   :  { %1084 = vmatmul.bf16.gmra.mxu2 %v952_v49  ;;  %v631_v56 = vpack.c.bf16 %v586_v44, %v585_v43  ;;  %v495_v43 = vadd.f32 %v2623_v25, %v2826_v46 }
 0x17e   :  { %v757_v54 = vpop.f32.mrf.mxu1 }
 0x17f   :  { %v758_v57 = vadd.f32 %v2732_v0, %v757_v54 }
 0x181   :  { %796 = vmatmul.bf16.gmra.mxu1 %v628_v51  ;;  %v896_v1 = vmax.f32 %v758_v57, 0.0  ;;  %v2881_v51 = vpop.f32.mrf.mxu3  ;;  %v485_v57 = vadd.f32 %v2623_v25, %v2776_v10 }
 0x183   :  { %v587_v29 = vmax.f32 %v485_v57, 0.0 }
 0x185   :  { %v632_v11 = vpack.c.bf16 %v588_v6, %v587_v29  ;;  %v500_v29 = vadd.f32 %v2623_v25, %v2852_v5 }
 0x186   :  { %v759_v58 = vpop.f32.mrf.mxu1 }
 0x187   :  { %v760_v63 = vadd.f32 %v2732_v0, %v759_v58 }
 0x189   :  { %v897_v2 = vmax.f32 %v760_v63, 0.0 }
 0x18b   :  { %v953_v7 = vpack.c.bf16 %v897_v2, %v896_v1 }
 0x18d   :  { %1089 = vmatmul.bf16.gmra.mxu2 %v953_v7 }
 0x18e   :  { %v762_v8 = vpop.f32.mrf.mxu1 }
 0x18f   :  { %v763_v12 = vadd.f32 %v2732_v0, %v762_v8 }
 0x191   :  { %801 = vmatmul.bf16.gmra.mxu1 %v629_v19  ;;  %v898_v18 = vmax.f32 %v763_v12, 0.0  ;;  %v2891_v12 = vpop.f32.mrf.mxu3 }
 0x196   :  { %v764_v13 = vpop.f32.mrf.mxu1 }
 0x197   :  { %v765_v15 = vadd.f32 %v2732_v0, %v764_v13 }
 0x199   :  { %v899_v20 = vmax.f32 %v765_v15, 0.0  ;;  %v490_v15 = vadd.f32 %v2623_v25, %v2794_v16 }
 0x19b   :  { %v954_v23 = vpack.c.bf16 %v899_v20, %v898_v18  ;;  %v2896_v20 = vpop.f32.mrf.mxu3  ;;  %v589_v31 = vmax.f32 %v490_v15, 0.0 }
 0x19d   :  { %1094 = vmatmul.bf16.gmra.mxu2 %v954_v23 }
 0x19e   :  { %v767_v24 = vpop.f32.mrf.mxu1 }
 0x19f   :  { %v768_v40 = vadd.f32 %v2732_v0, %v767_v24 }
 0x1a0   :  { %v1055_v28 = vpop.f32.mrf.mxu2 }
 0x1a1   :  { %806 = vmatmul.bf16.gmra.mxu1 %v630_v27  ;;  %v1056_v34 = vadd.f32 %v2869_v32, %v1055_v28  ;;  %v900_v38 = vmax.f32 %v768_v40, 0.0 }
 0x1a3   :  { %v1215_v47 = vmax.f32 %v1056_v34, 0.0 }
 0x1a6   :  { %v769_v45 = vpop.f32.mrf.mxu1 }
 0x1a7   :  { %v770_v35 = vadd.f32 %v2732_v0, %v769_v45  ;;  %v590_v45 = vmax.f32 %v492_v21, 0.0 }
 0x1a8   :  { %v1057_v36 = vpop.f32.mrf.mxu2 }
 0x1a9   :  { %v901_v41 = vmax.f32 %v770_v35, 0.0  ;;  %v1058_v42 = vadd.f32 %v2869_v32, %v1057_v36 }
 0x1ab   :  { %v1216_v48 = vmax.f32 %v1058_v42, 0.0  ;;  %v955_v50 = vpack.c.bf16 %v901_v41, %v900_v38  ;;  %v633_v38 = vpack.c.bf16 %v590_v45, %v589_v31  ;;  %v2903_v41 = vpop.f32.mrf.mxu3  ;;  %v507_v45 = vadd.f32 %v2623_v25, %v2847_v3 }
 0x1ad   :  { %1099 = vmatmul.bf16.gmra.mxu2 %v955_v50  ;;  %v1279_v49 = vpack.c.bf16 %v1216_v48, %v1215_v47  ;;  %v497_v47 = vadd.f32 %v2623_v25, %v2836_v55 }
 0x1ae   :  { %v772_v54 = vpop.f32.mrf.mxu1 }
 0x1af   :  { %1387 = vmatmul.bf16.vlgmr.msrb.gmra.mxu3 %v1279_v49  ;;  %v773_v53 = vadd.f32 %v2732_v0, %v772_v54 }
 0x1b0   :  { %v1060_v59 = vpop.f32.mrf.mxu2 }
 0x1b1   :  { %811 = vmatmul.bf16.gmra.mxu1 %v631_v56  ;;  %v1061_v61 = vadd.f32 %v2869_v32, %v1060_v59  ;;  %v902_v1 = vmax.f32 %v773_v53, 0.0  ;;  %v591_v53 = vmax.f32 %v495_v43, 0.0  ;;  %v596_v43 = vmax.f32 %v507_v45, 0.0 }
 0x1b3   :  { %v1217_v7 = vmax.f32 %v1061_v61, 0.0  ;;  %v2913_v57 = vpop.f32.mrf.mxu3 }
 0x1b6   :  { %v774_v58 = vpop.f32.mrf.mxu1 }
 0x1b7   :  { %v775_v62 = vadd.f32 %v2732_v0, %v774_v58  ;;  %v592_v58 = vmax.f32 %v497_v47, 0.0 }
 0x1b8   :  { %v1062_v63 = vpop.f32.mrf.mxu2 }
 0x1b9   :  { %v903_v2 = vmax.f32 %v775_v62, 0.0  ;;  %v1063_v4 = vadd.f32 %v2869_v32, %v1062_v63  ;;  %v634_v55 = vpack.c.bf16 %v592_v58, %v591_v53  ;;  %v510_v58 = vadd.f32 %v2623_v25, %v2854_v9 }
 0x1bb   :  { %v1218_v8 = vmax.f32 %v1063_v4, 0.0  ;;  %v956_v19 = vpack.c.bf16 %v903_v2, %v902_v1  ;;  %v2915_v2 = vpop.f32.mrf.mxu3 }
 0x1bd   :  { %1104 = vmatmul.bf16.gmra.mxu2 %v956_v19  ;;  %v1280_v10 = vpack.c.bf16 %v1218_v8, %v1217_v7  ;;  %v502_v7 = vadd.f32 %v2623_v25, %v2862_v17 }
 0x1be   :  { %v777_v13 = vpop.f32.mrf.mxu1 }
 0x1bf   :  { %1392 = vmatmul.bf16.gmra.mxu3 %v1280_v10  ;;  %v778_v30 = vadd.f32 %v2732_v0, %v777_v13  ;;  %v594_v15 = vmax.f32 %v502_v7, 0.0 }
 0x1c0   :  { %v1065_v14 = vpop.f32.mrf.mxu2 }
 0x1c1   :  { %816 = vmatmul.bf16.gmra.mxu1 %v632_v11  ;;  %v1066_v22 = vadd.f32 %v2869_v32, %v1065_v14  ;;  %v904_v27 = vmax.f32 %v778_v30, 0.0  ;;  %v593_v30 = vmax.f32 %v500_v29, 0.0 }
 0x1c3   :  { %v1219_v33 = vmax.f32 %v1066_v22, 0.0  ;;  %v635_v17 = vpack.c.bf16 %v594_v15, %v593_v30  ;;  %v2419_v15 = vld [vmem:[%s3321_s9 + $0x18] sm:$0xff] }
 0x1c6   :  { %v779_v18 = vpop.f32.mrf.mxu1 }
 0x1c7   :  { %v780_v23 = vadd.f32 %v2732_v0, %v779_v18 }
 0x1c8   :  { %v1067_v24 = vpop.f32.mrf.mxu2 }
 0x1c9   :  { %v905_v28 = vmax.f32 %v780_v23, 0.0  ;;  %v1068_v40 = vadd.f32 %v2869_v32, %v1067_v24  ;;  %v2925_v24 = vpop.f32.mrf.mxu3 }
 0x1cb   :  { %v1220_v34 = vmax.f32 %v1068_v40, 0.0  ;;  %v957_v16 = vpack.c.bf16 %v905_v28, %v904_v27  ;;  %v505_v40 = vadd.f32 %v2623_v25, %v2831_v52 }
 0x1cd   :  { %1109 = vmatmul.bf16.gmra.mxu2 %v957_v16  ;;  %v1281_v35 = vpack.c.bf16 %v1220_v34, %v1219_v33 }
 0x1ce   :  { %v782_v36 = vpop.f32.mrf.mxu1 }
 0x1cf   :  { %1397 = vmatmul.bf16.gmra.mxu3 %v1281_v35  ;;  %v783_v42 = vadd.f32 %v2732_v0, %v782_v36 }
 0x1d0   :  { %v1070_v39 = vpop.f32.mrf.mxu2 }
 0x1d1   :  { %821 = vmatmul.bf16.gmra.mxu1 %v633_v38  ;;  %v1071_v48 = vadd.f32 %v2869_v32, %v1070_v39  ;;  %v906_v54 = vmax.f32 %v783_v42, 0.0  ;;  %v2934_v35 = vpop.f32.mrf.mxu3  ;;  %v595_v42 = vmax.f32 %v505_v40, 0.0 }
 0x1d3   :  { %v1221_v60 = vmax.f32 %v1071_v48, 0.0  ;;  %v636_v3 = vpack.c.bf16 %v596_v43, %v595_v42 }
 0x1d6   :  { %v784_v44 = vpop.f32.mrf.mxu1 }
 0x1d7   :  { %v785_v50 = vadd.f32 %v2732_v0, %v784_v44 }
 0x1d8   :  { %v1072_v49 = vpop.f32.mrf.mxu2 }
 0x1d9   :  { %v907_v56 = vmax.f32 %v785_v50, 0.0  ;;  %v1073_v59 = vadd.f32 %v2869_v32, %v1072_v49 }
 0x1db   :  { %v1222_v61 = vmax.f32 %v1073_v59, 0.0  ;;  %v958_v46 = vpack.c.bf16 %v907_v56, %v906_v54  ;;  %v2423_v54 = vld [vmem:[%s3321_s9 + $0x38] sm:$0xff]  ;;  %v2940_v56 = vpop.f32.mrf.mxu3  ;;  %v2422_v59 = vld [vmem:[%s3321_s9 + $0x30] sm:$0xff] }
 0x1dc   :  { %1712 = vmatpush.bf16.msrb.mxu0 %v2423_v54 }
 0x1dd   :  { %1114 = vmatmul.bf16.gmra.mxu2 %v958_v46  ;;  %v1282_v62 = vpack.c.bf16 %v1222_v61, %v1221_v60  ;;  %v512_v61 = vadd.f32 %v2623_v25, %v2864_v26 }
 0x1de   :  { %v787_v63 = vpop.f32.mrf.mxu1 }
 0x1df   :  { %1402 = vmatmul.bf16.gmra.mxu3 %v1282_v62  ;;  %v788_v4 = vadd.f32 %v2732_v0, %v787_v63  ;;  %v598_v9 = vmax.f32 %v512_v61, 0.0 }
 0x1e0   :  { %v1075_v1 = vpop.f32.mrf.mxu2  ;;  %1713 = vmatpush.bf16.msrb.mxu0 %v2422_v59 }
 0x1e1   :  { %826 = vmatmul.bf16.gmra.mxu1 %v634_v55  ;;  %v1076_v8 = vadd.f32 %v2869_v32, %v1075_v1  ;;  %v908_v13 = vmax.f32 %v788_v4, 0.0  ;;  %v2421_v55 = vld [vmem:[%s3321_s9 + $0x28] sm:$0xff] }
 0x1e3   :  { %v1223_v18 = vmax.f32 %v1076_v8, 0.0  ;;  %v2956_v26 = vpop.f32.mrf.mxu3 }
 0x1e4   :  { %1714 = vmatpush.bf16.msrb.mxu0 %v2421_v55 }
 0x1e6   :  { %v789_v6 = vpop.f32.mrf.mxu1 }
 0x1e7   :  { %v790_v19 = vadd.f32 %v2732_v0, %v789_v6  ;;  %v597_v6 = vmax.f32 %v510_v58, 0.0 }
 0x1e8   :  { %v1077_v10 = vpop.f32.mrf.mxu2 }
 0x1e9   :  { %v909_v11 = vmax.f32 %v790_v19, 0.0  ;;  %v1078_v14 = vadd.f32 %v2869_v32, %v1077_v10  ;;  %v2420_v10 = vld [vmem:[%s3321_s9 + $0x20] sm:$0xff] }
 0x1ea   :  { %1715 = vmatpush.bf16.msrb.mxu0 %v2420_v10 }
 0x1eb   :  { %v1224_v21 = vmax.f32 %v1078_v14, 0.0  ;;  %v959_v22 = vpack.c.bf16 %v909_v11, %v908_v13  ;;  %v637_v14 = vpack.c.bf16 %v598_v9, %v597_v6 }
 0x1ed   :  { %1119 = vmatmul.bf16.gmra.mxu2 %v959_v22  ;;  %v1283_v5 = vpack.c.bf16 %v1224_v21, %v1223_v18  ;;  %v2418_v18 = vld [vmem:[%s3321_s9 + $0x10] sm:$0xff]  ;;  %v515_v22 = vadd.f32 %v2623_v25, %v2878_v37 }
 0x1ee   :  { %v792_v23 = vpop.f32.mrf.mxu1  ;;  %1716 = vmatpush.bf16.msrb.mxu0 %v2419_v15 }
 0x1ef   :  { %1407 = vmatmul.bf16.gmra.mxu3 %v1283_v5  ;;  %v793_v28 = vadd.f32 %v2732_v0, %v792_v23  ;;  %v2970_v5 = vpop.f32.mrf.mxu3 }
 0x1f0   :  { %v1080_v27 = vpop.f32.mrf.mxu2 }
 0x1f1   :  { %831 = vmatmul.bf16.gmra.mxu1 %v635_v17  ;;  %v1081_v33 = vadd.f32 %v2869_v32, %v1080_v27  ;;  %v910_v36 = vmax.f32 %v793_v28, 0.0  ;;  %v517_v17 = vadd.f32 %v2623_v25, %v2881_v51  ;;  %v2416_v51 = vld [vmem:[%s3321_s9] sm:$0xff] }
 0x1f2   :  { %1717 = vmatpush.bf16.msrb.mxu0 %v2418_v18 }
 0x1f3   :  { %v1225_v44 = vmax.f32 %v1081_v33, 0.0 }
 0x1f6   :  { %v794_v31 = vpop.f32.mrf.mxu1 }
 0x1f7   :  { %v795_v34 = vadd.f32 %v2732_v0, %v794_v31  ;;  %v2417_v31 = vld [vmem:[%s3321_s9 + $0x8] sm:$0xff] }
 0x1f8   :  { %v1082_v16 = vpop.f32.mrf.mxu2  ;;  %1718 = vmatpush.bf16.msrb.mxu0 %v2417_v31 }
 0x1f9   :  { %v911_v38 = vmax.f32 %v795_v34, 0.0  ;;  %v1083_v39 = vadd.f32 %v2869_v32, %v1082_v16  ;;  %v599_v34 = vmax.f32 %v515_v22, 0.0  ;;  %v600_v16 = vmax.f32 %v517_v17, 0.0 }
 0x1fb   :  { %v1226_v47 = vmax.f32 %v1083_v39, 0.0  ;;  %v960_v52 = vpack.c.bf16 %v911_v38, %v910_v36 }
 0x1fc   :  { %1719 = vmatpush.bf16.msrb.mxu0 %v2416_v51 }
 0x1fd   :  { %1124 = vmatmul.bf16.gmra.mxu2 %v960_v52  ;;  %v1284_v48 = vpack.c.bf16 %v1226_v47, %v1225_v44  ;;  %v638_v44 = vpack.c.bf16 %v600_v16, %v599_v34  ;;  %v2983_v47 = vpop.f32.mrf.mxu3 }
 0x1fe   :  { %v797_v50 = vpop.f32.mrf.mxu1 }
 0x1ff   :  { %1412 = vmatmul.bf16.gmra.mxu3 %v1284_v48  ;;  %v798_v53 = vadd.f32 %v2732_v0, %v797_v50  ;;  %v520_v50 = vadd.f32 %v2623_v25, %v2891_v12 }
 0x200   :  { %v1085_v49 = vpop.f32.mrf.mxu2 }
 0x201   :  { %836 = vmatmul.bf16.gmra.mxu1 %v636_v3  ;;  %v1086_v46 = vadd.f32 %v2869_v32, %v1085_v49  ;;  %v912_v1 = vmax.f32 %v798_v53, 0.0  ;;  %v522_v49 = vadd.f32 %v2623_v25, %v2896_v20 }
 0x203   :  { %v1227_v7 = vmax.f32 %v1086_v46, 0.0  ;;  %v601_v46 = vmax.f32 %v520_v50, 0.0 }
 0x206   :  { %v799_v60 = vpop.f32.mrf.mxu1 }
 0x207   :  { %v800_v62 = vadd.f32 %v2732_v0, %v799_v60 }
 0x208   :  { %v1087_v63 = vpop.f32.mrf.mxu2 }
 0x209   :  { %v913_v4 = vmax.f32 %v800_v62, 0.0  ;;  %v1088_v29 = vadd.f32 %v2869_v32, %v1087_v63  ;;  %v2993_v62 = vpop.f32.mrf.mxu3  ;;  %v602_v63 = vmax.f32 %v522_v49, 0.0 }
 0x20b   :  { %v1228_v8 = vmax.f32 %v1088_v29, 0.0  ;;  %v961_v19 = vpack.c.bf16 %v913_v4, %v912_v1  ;;  %v639_v25 = vpack.c.bf16 %v602_v63, %v601_v46 }
 0x20d   :  { %1129 = vmatmul.bf16.gmra.mxu2 %v961_v19  ;;  %v1285_v13 = vpack.c.bf16 %v1228_v8, %v1227_v7  ;;  %v2999_v7 = vld [vmem:[%s3320_s8] ss:$0 sm:$0xff] }
 0x20e   :  { %v802_v11 = vpop.f32.mrf.mxu1  ;;  %v3004_v8 = vld [vmem:[%s3314_s2] ss:$0 sm:$0xff] }
 0x20f   :  { %1417 = vmatmul.bf16.gmra.mxu3 %v1285_v13  ;;  %v803_v21 = vadd.f32 %v2732_v0, %v802_v11  ;;  %v525_v19 = vadd.f32 %v3004_v8, %v2903_v41  ;;  %v527_v10 = vadd.f32 %v3004_v8, %v2913_v57  ;;  %v530_v51 = vadd.f32 %v3004_v8, %v2915_v2 }
 0x210   :  { %v1090_v30 = vpop.f32.mrf.mxu2 }
 0x211   :  { %841 = vmatmul.bf16.gmra.mxu1 %v637_v14  ;;  %v1091_v27 = vadd.f32 %v2869_v32, %v1090_v30  ;;  %v914_v45 = vmax.f32 %v803_v21, 0.0  ;;  %v604_v17 = vmax.f32 %v527_v10, 0.0 }
 0x213   :  { %v1229_v36 = vmax.f32 %v1091_v27, 0.0 }
 0x216   :  { %v804_v23 = vpop.f32.mrf.mxu1 }
 0x217   :  { %v805_v28 = vadd.f32 %v2732_v0, %v804_v23  ;;  %v603_v23 = vmax.f32 %v525_v19, 0.0 }
 0x218   :  { %v1092_v40 = vpop.f32.mrf.mxu2 }
 0x219   :  { %v915_v33 = vmax.f32 %v805_v28, 0.0  ;;  %v1093_v37 = vadd.f32 %v2869_v32, %v1092_v40  ;;  %v640_v34 = vpack.c.bf16 %v604_v17, %v603_v23 }
 0x21b   :  { %v1230_v38 = vmax.f32 %v1093_v37, 0.0  ;;  %v962_v39 = vpack.c.bf16 %v915_v33, %v914_v45 }
 0x21d   :  { %1134 = vmatmul.bf16.gmra.mxu2 %v962_v39  ;;  %v1286_v42 = vpack.c.bf16 %v1230_v38, %v1229_v36 }
 0x21e   :  { %v807_v43 = vpop.f32.mrf.mxu1 }
 0x21f   :  { %1422 = vmatmul.bf16.gmra.mxu3 %v1286_v42  ;;  %v808_v48 = vadd.f32 %v2732_v0, %v807_v43  ;;  %v532_v42 = vadd.f32 %v3004_v8, %v2925_v24 }
 0x220   :  { %v1095_v52 = vpop.f32.mrf.mxu2 }
 0x221   :  { %846 = vmatmul.bf16.gmra.mxu1 %v638_v44  ;;  %v1096_v54 = vadd.f32 %v2869_v32, %v1095_v52  ;;  %v916_v58 = vmax.f32 %v808_v48, 0.0 }
 0x223   :  { %v1231_v55 = vmax.f32 %v1096_v54, 0.0 }
 0x226   :  { %v809_v3 = vpop.f32.mrf.mxu1 }
 0x227   :  { %v810_v59 = vadd.f32 %v2732_v0, %v809_v3 }
 0x228   :  { %v1097_v53 = vpop.f32.mrf.mxu2 }
 0x229   :  { %v917_v60 = vmax.f32 %v810_v59, 0.0  ;;  %v1098_v61 = vadd.f32 %v2869_v32, %v1097_v53  ;;  %v605_v59 = vmax.f32 %v530_v51, 0.0  ;;  %v606_v53 = vmax.f32 %v532_v42, 0.0 }
 0x22b   :  { %v1232_v1 = vmax.f32 %v1098_v61, 0.0  ;;  %v963_v12 = vpack.c.bf16 %v917_v60, %v916_v58 }
 0x22d   :  { %1139 = vmatmul.bf16.gmra.mxu2 %v963_v12  ;;  %v1287_v4 = vpack.c.bf16 %v1232_v1, %v1231_v55  ;;  %v641_v12 = vpack.c.bf16 %v606_v53, %v605_v59 }
 0x22e   :  { %v812_v29 = vpop.f32.mrf.mxu1 }
 0x22f   :  { %1427 = vmatmul.bf16.gmra.mxu3 %v1287_v4  ;;  %v813_v9 = vadd.f32 %v2732_v0, %v812_v29 }
 0x230   :  { %v1100_v20 = vpop.f32.mrf.mxu2 }
 0x231   :  { %851 = vmatmul.bf16.gmra.mxu1 %v639_v25  ;;  %v1101_v11 = vadd.f32 %v2869_v32, %v1100_v20  ;;  %v918_v15 = vmax.f32 %v813_v9, 0.0  ;;  %v537_v9 = vadd.f32 %v3004_v8, %v2940_v56 }
 0x232   :  { %v1388_v6 = vpop.f32.mrf.mxu3 }
 0x233   :  { %v1389_v18 = vadd.f32 %v2999_v7, %v1388_v6  ;;  %v1233_v28 = vmax.f32 %v1101_v11, 0.0  ;;  %v535_v6 = vadd.f32 %v3004_v8, %v2934_v35 }
 0x235   :  { %v1548_v31 = vmax.f32 %v1389_v18, 0.0 }
 0x236   :  { %v814_v13 = vpop.f32.mrf.mxu1 }
 0x237   :  { %v815_v14 = vadd.f32 %v2732_v0, %v814_v13 }
 0x238   :  { %v1102_v30 = vpop.f32.mrf.mxu2 }
 0x239   :  { %v919_v21 = vmax.f32 %v815_v14, 0.0  ;;  %v1103_v22 = vadd.f32 %v2869_v32, %v1102_v30 }
 0x23a   :  { %v1390_v27 = vpop.f32.mrf.mxu3 }
 0x23b   :  { %v1234_v41 = vmax.f32 %v1103_v22, 0.0  ;;  %v1391_v40 = vadd.f32 %v2999_v7, %v1390_v27  ;;  %v964_v57 = vpack.c.bf16 %v919_v21, %v918_v15  ;;  %v607_v21 = vmax.f32 %v535_v6, 0.0 }
 0x23c   :  { %v608_v22 = vmax.f32 %v537_v9, 0.0 }
 0x23d   :  { %v1549_v45 = vmax.f32 %v1391_v40, 0.0  ;;  %1144 = vmatmul.bf16.gmra.mxu2 %v964_v57  ;;  %v1288_v33 = vpack.c.bf16 %v1234_v41, %v1233_v28 }
 0x23e   :  { %v817_v37 = vpop.f32.mrf.mxu1 }
 0x23f   :  { %1432 = vmatmul.bf16.gmra.mxu3 %v1288_v33  ;;  %v1612_v16 = vpack.c.bf16 %v1549_v45, %v1548_v31  ;;  %v818_v39 = vadd.f32 %v2732_v0, %v817_v37  ;;  %v642_v31 = vpack.c.bf16 %v608_v22, %v607_v21 }
 0x240   :  { %v1105_v36 = vpop.f32.mrf.mxu2 }
 0x241   :  { %856 = vmatmul.bf16.gmra.mxu1 %v640_v34  ;;  %1720 = vmatmul.bf16.vlgmr.msrb.gmra.mxu0 %v1612_v16  ;;  %v1106_v44 = vadd.f32 %v2869_v32, %v1105_v36  ;;  %v920_v50 = vmax.f32 %v818_v39, 0.0  ;;  %v540_v16 = vadd.f32 %v3004_v8, %v2956_v26  ;;  %v542_v36 = vadd.f32 %v3004_v8, %v2970_v5 }
 0x242   :  { %v1393_v38 = vpop.f32.mrf.mxu3 }
 0x243   :  { %v1394_v3 = vadd.f32 %v2999_v7, %v1393_v38  ;;  %v1235_v60 = vmax.f32 %v1106_v44, 0.0 }
 0x245   :  { %v1550_v46 = vmax.f32 %v1394_v3, 0.0  ;;  %v610_v3 = vmax.f32 %v542_v36, 0.0 }
 0x246   :  { %v819_v43 = vpop.f32.mrf.mxu1 }
 0x247   :  { %v820_v52 = vadd.f32 %v2732_v0, %v819_v43 }
 0x248   :  { %v1107_v48 = vpop.f32.mrf.mxu2 }
 0x249   :  { %v921_v49 = vmax.f32 %v820_v52, 0.0  ;;  %v1108_v54 = vadd.f32 %v2869_v32, %v1107_v48 }
 0x24a   :  { %v1395_v58 = vpop.f32.mrf.mxu3 }
 0x24b   :  { %v1236_v2 = vmax.f32 %v1108_v54, 0.0  ;;  %v1396_v61 = vadd.f32 %v2999_v7, %v1395_v58  ;;  %v965_v24 = vpack.c.bf16 %v921_v49, %v920_v50  ;;  %v609_v50 = vmax.f32 %v540_v16, 0.0 }
 0x24d   :  { %v1551_v63 = vmax.f32 %v1396_v61, 0.0  ;;  %1149 = vmatmul.bf16.gmra.mxu2 %v965_v24  ;;  %v1289_v55 = vpack.c.bf16 %v1236_v2, %v1235_v60  ;;  %v643_v2 = vpack.c.bf16 %v610_v3, %v609_v50 }
 0x24e   :  { %v822_v1 = vpop.f32.mrf.mxu1 }
 0x24f   :  { %1437 = vmatmul.bf16.gmra.mxu3 %v1289_v55  ;;  %v1613_v4 = vpack.c.bf16 %v1551_v63, %v1550_v46  ;;  %v823_v20 = vadd.f32 %v2732_v0, %v822_v1  ;;  %v3048_v63 = vld [vmem:[%s3316_s4] ss:$0 sm:$0xff]  ;;  %v545_v1 = vadd.f32 %v3004_v8, %v2983_v47 }
 0x250   :  { %v1110_v29 = vpop.f32.mrf.mxu2 }
 0x251   :  { %861 = vmatmul.bf16.gmra.mxu1 %v641_v12  ;;  %1725 = vmatmul.bf16.gmra.mxu0 %v1613_v4  ;;  %v1111_v10 = vadd.f32 %v2869_v32, %v1110_v29  ;;  %v922_v14 = vmax.f32 %v823_v20, 0.0  ;;  %v547_v12 = vadd.f32 %v3004_v8, %v2993_v62 }
 0x252   :  { %v1398_v25 = vpop.f32.mrf.mxu3 }
 0x253   :  { %v1399_v30 = vadd.f32 %v2999_v7, %v1398_v25  ;;  %v1237_v17 = vmax.f32 %v1111_v10, 0.0 }
 0x255   :  { %v1552_v28 = vmax.f32 %v1399_v30, 0.0 }
 0x256   :  { %v824_v19 = vpop.f32.mrf.mxu1 }
 0x257   :  { %v825_v13 = vadd.f32 %v2732_v0, %v824_v19 }
 0x258   :  { %v1112_v11 = vpop.f32.mrf.mxu2 }
 0x259   :  { %v923_v15 = vmax.f32 %v825_v13, 0.0  ;;  %v1113_v18 = vadd.f32 %v2869_v32, %v1112_v11  ;;  %v611_v13 = vmax.f32 %v545_v1, 0.0  ;;  %v612_v11 = vmax.f32 %v547_v12, 0.0 }
 0x25a   :  { %v1400_v23 = vpop.f32.mrf.mxu3 }
 0x25b   :  { %v1238_v35 = vmax.f32 %v1113_v18, 0.0  ;;  %v1401_v27 = vadd.f32 %v2999_v7, %v1400_v23  ;;  %v966_v56 = vpack.c.bf16 %v923_v15, %v922_v14  ;;  %v644_v23 = vpack.c.bf16 %v612_v11, %v611_v13 }
 0x25d   :  { %v1553_v41 = vmax.f32 %v1401_v27, 0.0  ;;  %1154 = vmatmul.bf16.gmra.mxu2 %v966_v56  ;;  %v1290_v40 = vpack.c.bf16 %v1238_v35, %v1237_v17 }
 0x25e   :  { %v827_v57 = vpop.f32.mrf.mxu1 }
 0x25f   :  { %1442 = vmatmul.bf16.gmra.mxu3 %v1290_v40  ;;  %v1614_v45 = vpack.c.bf16 %v1553_v41, %v1552_v28  ;;  %v828_v34 = vadd.f32 %v2732_v0, %v827_v57 }
 0x260   :  { %v1115_v33 = vpop.f32.mrf.mxu2 }
 0x261   :  { %866 = vmatmul.bf16.gmra.mxu1 %v642_v31  ;;  %1730 = vmatmul.bf16.gmra.mxu0 %v1614_v45  ;;  %v1116_v39 = vadd.f32 %v2869_v32, %v1115_v33  ;;  %v924_v43 = vmax.f32 %v828_v34, 0.0 }
 0x262   :  { %v1403_v37 = vpop.f32.mrf.mxu3 }
 0x263   :  { %v1404_v44 = vadd.f32 %v2999_v7, %v1403_v37  ;;  %v1239_v54 = vmax.f32 %v1116_v39, 0.0 }
 0x265   :  { %v1554_v53 = vmax.f32 %v1404_v44, 0.0 }
 0x266   :  { %v829_v38 = vpop.f32.mrf.mxu1 }
 0x267   :  { %v830_v51 = vadd.f32 %v2732_v0, %v829_v38 }
 0x268   :  { %v1117_v42 = vpop.f32.mrf.mxu2 }
 0x269   :  { %v925_v52 = vmax.f32 %v830_v51, 0.0  ;;  %v1118_v48 = vadd.f32 %v2869_v32, %v1117_v42 }
 0x26a   :  { %v1405_v49 = vpop.f32.mrf.mxu3 }
 0x26b   :  { %v1240_v26 = vmax.f32 %v1118_v48, 0.0  ;;  %v1406_v59 = vadd.f32 %v2999_v7, %v1405_v49  ;;  %v967_v5 = vpack.c.bf16 %v925_v52, %v924_v43 }
 0x26d   :  { %v1555_v58 = vmax.f32 %v1406_v59, 0.0  ;;  %1159 = vmatmul.bf16.gmra.mxu2 %v967_v5  ;;  %v1291_v60 = vpack.c.bf16 %v1240_v26, %v1239_v54 }
 0x26e   :  { %v832_v0 = vpop.f32.mrf.mxu1 }
 0x26f   :  { %1447 = vmatmul.bf16.gmra.mxu3 %v1291_v60  ;;  %v1615_v61 = vpack.c.bf16 %v1555_v58, %v1554_v53  ;;  %v833_v55 = vadd.f32 %v3048_v63, %v832_v0 }
 0x270   :  { %v1120_v24 = vpop.f32.mrf.mxu2 }
 0x271   :  { %871 = vmatmul.bf16.gmra.mxu1 %v643_v2  ;;  %1735 = vmatmul.bf16.gmra.mxu0 %v1615_v61  ;;  %v1121_v29 = vadd.f32 %v2869_v32, %v1120_v24  ;;  %v926_v6 = vmax.f32 %v833_v55, 0.0 }
 0x272   :  { %v1408_v46 = vpop.f32.mrf.mxu3 }
 0x273   :  { %v1409_v9 = vadd.f32 %v2999_v7, %v1408_v46  ;;  %v1241_v30 = vmax.f32 %v1121_v29, 0.0 }
 0x275   :  { %v1556_v8 = vmax.f32 %v1409_v9, 0.0 }
 0x276   :  { %v834_v4 = vpop.f32.mrf.mxu1 }
 0x277   :  { %v835_v25 = vadd.f32 %v3048_v63, %v834_v4 }
 0x278   :  { %v1122_v20 = vpop.f32.mrf.mxu2 }
 0x279   :  { %v927_v19 = vmax.f32 %v835_v25, 0.0  ;;  %v1123_v10 = vadd.f32 %v2869_v32, %v1122_v20 }
 0x27a   :  { %v1410_v14 = vpop.f32.mrf.mxu3 }
 0x27b   :  { %v968_v47 = vpack.c.bf16 %v927_v19, %v926_v6  ;;  %v1242_v15 = vmax.f32 %v1123_v10, 0.0  ;;  %v1411_v62 = vadd.f32 %v2999_v7, %v1410_v14 }
 0x27d   :  { %v1557_v18 = vmax.f32 %v1411_v62, 0.0  ;;  %1164 = vmatmul.bf16.gmra.mxu2 %v968_v47  ;;  %v1292_v21 = vpack.c.bf16 %v1242_v15, %v1241_v30 }
 0x27e   :  { %v837_v22 = vpop.f32.mrf.mxu1 }
 0x27f   :  { %1452 = vmatmul.bf16.gmra.mxu3 %v1292_v21  ;;  %v1616_v17 = vpack.c.bf16 %v1557_v18, %v1556_v8  ;;  %v838_v56 = vadd.f32 %v3048_v63, %v837_v22 }
 0x280   :  { %v1125_v35 = vpop.f32.mrf.mxu2 }
 0x281   :  { %876 = vmatmul.bf16.gmra.mxu1 %v644_v23  ;;  %1740 = vmatmul.bf16.gmra.mxu0 %v1616_v17  ;;  %v1126_v41 = vadd.f32 %v2869_v32, %v1125_v35  ;;  %v928_v31 = vmax.f32 %v838_v56, 0.0 }
 0x282   :  { %v1413_v27 = vpop.f32.mrf.mxu3 }
 0x283   :  { %v1414_v45 = vadd.f32 %v2999_v7, %v1413_v27  ;;  %v1243_v16 = vmax.f32 %v1126_v41, 0.0 }
 0x285   :  { %v1558_v51 = vmax.f32 %v1414_v45, 0.0 }
 0x286   :  { %v839_v28 = vpop.f32.mrf.mxu1 }
 0x287   :  { %v840_v40 = vadd.f32 %v3048_v63, %v839_v28 }
 0x288   :  { %v1127_v57 = vpop.f32.mrf.mxu2 }
 0x289   :  { %v929_v33 = vmax.f32 %v840_v40, 0.0  ;;  %v1128_v37 = vadd.f32 %v2869_v32, %v1127_v57 }
 0x28a   :  { %v1415_v34 = vpop.f32.mrf.mxu3 }
 0x28b   :  { %v969_v36 = vpack.c.bf16 %v929_v33, %v928_v31  ;;  %v1244_v38 = vmax.f32 %v1128_v37, 0.0  ;;  %v1416_v39 = vadd.f32 %v2999_v7, %v1415_v34 }
 0x28d   :  { %v1559_v42 = vmax.f32 %v1416_v39, 0.0  ;;  %1169 = vmatmul.bf16.gmra.mxu2 %v969_v36  ;;  %v1293_v43 = vpack.c.bf16 %v1244_v38, %v1243_v16 }
 0x28e   :  { %v842_v44 = vpop.f32.mrf.mxu1 }
 0x28f   :  { %1457 = vmatmul.bf16.gmra.mxu3 %v1293_v43  ;;  %v1617_v52 = vpack.c.bf16 %v1559_v42, %v1558_v51  ;;  %v843_v3 = vadd.f32 %v3048_v63, %v842_v44 }
 0x290   :  { %v1130_v48 = vpop.f32.mrf.mxu2 }
 0x291   :  { %1745 = vmatmul.bf16.gmra.mxu0 %v1617_v52  ;;  %v1131_v54 = vadd.f32 %v2869_v32, %v1130_v48  ;;  %v930_v5 = vmax.f32 %v843_v3, 0.0 }
 0x292   :  { %v1418_v50 = vpop.f32.mrf.mxu3 }
 0x293   :  { %v1419_v53 = vadd.f32 %v2999_v7, %v1418_v50  ;;  %v1245_v2 = vmax.f32 %v1131_v54, 0.0 }
 0x295   :  { %v1560_v55 = vmax.f32 %v1419_v53, 0.0 }
 0x296   :  { %v844_v49 = vpop.f32.mrf.mxu1 }
 0x297   :  { %v845_v26 = vadd.f32 %v3048_v63, %v844_v49  ;;  %v3087_v49 = vld [vmem:[%s3322_s10] ss:$0 sm:$0xff] }
 0x298   :  { %v1132_v59 = vpop.f32.mrf.mxu2 }
 0x299   :  { %v931_v58 = vmax.f32 %v845_v26, 0.0  ;;  %v1133_v60 = vadd.f32 %v2869_v32, %v1132_v59 }
 0x29a   :  { %v1420_v0 = vpop.f32.mrf.mxu3 }
 0x29b   :  { %v970_v61 = vpack.c.bf16 %v931_v58, %v930_v5  ;;  %v1246_v24 = vmax.f32 %v1133_v60, 0.0  ;;  %v1421_v46 = vadd.f32 %v2999_v7, %v1420_v0 }
 0x29d   :  { %v1561_v1 = vmax.f32 %v1421_v46, 0.0  ;;  %1174 = vmatmul.bf16.gmra.mxu2 %v970_v61  ;;  %v1294_v12 = vpack.c.bf16 %v1246_v24, %v1245_v2 }
 0x29e   :  { %v847_v4 = vpop.f32.mrf.mxu1 }
 0x29f   :  { %1462 = vmatmul.bf16.gmra.mxu3 %v1294_v12  ;;  %v1618_v29 = vpack.c.bf16 %v1561_v1, %v1560_v55  ;;  %v848_v6 = vadd.f32 %v3048_v63, %v847_v4 }
 0x2a0   :  { %v1135_v25 = vpop.f32.mrf.mxu2 }
 0x2a1   :  { %1750 = vmatmul.bf16.gmra.mxu0 %v1618_v29  ;;  %v1136_v19 = vadd.f32 %v2869_v32, %v1135_v25  ;;  %v932_v11 = vmax.f32 %v848_v6, 0.0 }
 0x2a2   :  { %v1423_v20 = vpop.f32.mrf.mxu3 }
 0x2a3   :  { %v1424_v14 = vadd.f32 %v2999_v7, %v1423_v20  ;;  %v1247_v62 = vmax.f32 %v1136_v19, 0.0 }
 0x2a5   :  { %v1562_v22 = vmax.f32 %v1424_v14, 0.0 }
 0x2a6   :  { %v849_v9 = vpop.f32.mrf.mxu1 }
 0x2a7   :  { %v850_v10 = vadd.f32 %v3048_v63, %v849_v9 }
 0x2a8   :  { %v1137_v13 = vpop.f32.mrf.mxu2 }
 0x2a9   :  { %v933_v30 = vmax.f32 %v850_v10, 0.0  ;;  %v1138_v47 = vadd.f32 %v2869_v32, %v1137_v13 }
 0x2aa   :  { %v1425_v15 = vpop.f32.mrf.mxu3 }
 0x2ab   :  { %v971_v8 = vpack.c.bf16 %v933_v30, %v932_v11  ;;  %v1248_v18 = vmax.f32 %v1138_v47, 0.0  ;;  %v1426_v21 = vadd.f32 %v2999_v7, %v1425_v15 }
 0x2ad   :  { %v1563_v23 = vmax.f32 %v1426_v21, 0.0  ;;  %1179 = vmatmul.bf16.gmra.mxu2 %v971_v8  ;;  %v1295_v17 = vpack.c.bf16 %v1248_v18, %v1247_v62  ;;  %v3104_v18 = vld [vmem:[%s3318_s6] ss:$0 sm:$0xff] }
 0x2ae   :  { %v852_v35 = vpop.f32.mrf.mxu1 }
 0x2af   :  { %1467 = vmatmul.bf16.gmra.mxu3 %v1295_v17  ;;  %v1619_v27 = vpack.c.bf16 %v1563_v23, %v1562_v22  ;;  %v853_v41 = vadd.f32 %v3048_v63, %v852_v35 }
 0x2b0   :  { %v1140_v56 = vpop.f32.mrf.mxu2 }
 0x2b1   :  { %1755 = vmatmul.bf16.gmra.mxu0 %v1619_v27  ;;  %v1141_v57 = vadd.f32 %v2869_v32, %v1140_v56  ;;  %v934_v33 = vmax.f32 %v853_v41, 0.0 }
 0x2b2   :  { %v1428_v28 = vpop.f32.mrf.mxu3 }
 0x2b3   :  { %v1429_v37 = vadd.f32 %v2999_v7, %v1428_v28  ;;  %v1249_v38 = vmax.f32 %v1141_v57, 0.0 }
 0x2b5   :  { %v1564_v43 = vmax.f32 %v1429_v37, 0.0 }
 0x2b6   :  { %v854_v40 = vpop.f32.mrf.mxu1 }
 0x2b7   :  { %v855_v31 = vadd.f32 %v3048_v63, %v854_v40 }
 0x2b8   :  { %v1142_v45 = vpop.f32.mrf.mxu2 }
 0x2b9   :  { %v935_v34 = vmax.f32 %v855_v31, 0.0  ;;  %v1143_v16 = vadd.f32 %v2869_v32, %v1142_v45 }
 0x2ba   :  { %v1430_v36 = vpop.f32.mrf.mxu3 }
 0x2bb   :  { %v972_v39 = vpack.c.bf16 %v935_v34, %v934_v33  ;;  %v1250_v51 = vmax.f32 %v1143_v16, 0.0  ;;  %v1431_v42 = vadd.f32 %v2999_v7, %v1430_v36 }
 0x2bd   :  { %v1565_v44 = vmax.f32 %v1431_v42, 0.0  ;;  %1184 = vmatmul.bf16.gmra.mxu2 %v972_v39  ;;  %v1296_v52 = vpack.c.bf16 %v1250_v51, %v1249_v38 }
 0x2be   :  { %v857_v48 = vpop.f32.mrf.mxu1  ;;  %v1721_v50 = vpop.f32.mrf.mxu0 }
 0x2bf   :  { %1472 = vmatmul.bf16.gmra.mxu3 %v1296_v52  ;;  %v1620_v3 = vpack.c.bf16 %v1565_v44, %v1564_v43  ;;  %v858_v59 = vadd.f32 %v3048_v63, %v857_v48  ;;  %v1722_v5 = vadd.f32 %v3087_v49, %v1721_v50 }
 0x2c0   :  { %v1145_v54 = vpop.f32.mrf.mxu2 }
 0x2c1   :  { %1760 = vmatmul.bf16.gmra.mxu0 %v1620_v3  ;;  %v1146_v53 = vadd.f32 %v2869_v32, %v1145_v54  ;;  %v936_v61 = vmax.f32 %v858_v59, 0.0  ;;  %v1881_v24 = vmax.f32 %v1722_v5, 0.0 }
 0x2c2   :  { %v1433_v26 = vpop.f32.mrf.mxu3 }
 0x2c3   :  { %v1434_v55 = vadd.f32 %v2999_v7, %v1433_v26  ;;  %v1251_v29 = vmax.f32 %v1146_v53, 0.0 }
 0x2c5   :  { %v1566_v10 = vmax.f32 %v1434_v55, 0.0 }
 0x2c6   :  { %v859_v58 = vpop.f32.mrf.mxu1  ;;  %v1723_v60 = vpop.f32.mrf.mxu0 }
 0x2c7   :  { %v860_v0 = vadd.f32 %v3048_v63, %v859_v58  ;;  %v1724_v2 = vadd.f32 %v3087_v49, %v1723_v60 }
 0x2c8   :  { %v1147_v46 = vpop.f32.mrf.mxu2 }
 0x2c9   :  { %v937_v1 = vmax.f32 %v860_v0, 0.0  ;;  %v1882_v12 = vmax.f32 %v1724_v2, 0.0  ;;  %v1148_v4 = vadd.f32 %v2869_v32, %v1147_v46 }
 0x2ca   :  { %v1435_v25 = vpop.f32.mrf.mxu3 }
 0x2cb   :  { %v973_v20 = vpack.c.bf16 %v937_v1, %v936_v61  ;;  %v1252_v6 = vmax.f32 %v1148_v4, 0.0  ;;  %v1436_v9 = vadd.f32 %v2999_v7, %v1435_v25  ;;  %v3097_v19 = vpack.c.bf16 %v1882_v12, %v1881_v24 }
 0x2cd   :  { %v1567_v13 = vmax.f32 %v1436_v9, 0.0  ;;  %1189 = vmatmul.bf16.gmra.mxu2 %v973_v20  ;;  %v1297_v11 = vpack.c.bf16 %v1252_v6, %v1251_v29 }
 0x2ce   :  { %v862_v14 = vpop.f32.mrf.mxu1  ;;  %v1726_v30 = vpop.f32.mrf.mxu0 }
 0x2cf   :  { %1477 = vmatmul.bf16.gmra.mxu3 %v1297_v11  ;;  %v1621_v47 = vpack.c.bf16 %v1567_v13, %v1566_v10  ;;  %v863_v32 = vadd.f32 %v3048_v63, %v862_v14  ;;  %v1727_v8 = vadd.f32 %v3087_v49, %v1726_v30 }
 0x2d0   :  { %v1150_v15 = vpop.f32.mrf.mxu2 }
 0x2d1   :  { %1765 = vmatmul.bf16.gmra.mxu0 %v1621_v47  ;;  %v1151_v21 = vadd.f32 %v3104_v18, %v1150_v15  ;;  %v938_v27 = vmax.f32 %v863_v32, 0.0  ;;  %v1883_v56 = vmax.f32 %v1727_v8, 0.0 }
 0x2d2   :  { %v1438_v62 = vpop.f32.mrf.mxu3 }
 0x2d3   :  { %v1439_v41 = vadd.f32 %v2999_v7, %v1438_v62  ;;  %v1253_v45 = vmax.f32 %v1151_v21, 0.0 }
 0x2d5   :  { %v1568_v38 = vmax.f32 %v1439_v41, 0.0 }
 0x2d6   :  { %v864_v22 = vpop.f32.mrf.mxu1  ;;  %v1728_v23 = vpop.f32.mrf.mxu0 }
 0x2d7   :  { %v865_v17 = vadd.f32 %v3048_v63, %v864_v22  ;;  %v1729_v35 = vadd.f32 %v3087_v49, %v1728_v23 }
 0x2d8   :  { %v1152_v28 = vpop.f32.mrf.mxu2 }
 0x2d9   :  { %v939_v40 = vmax.f32 %v865_v17, 0.0  ;;  %v1884_v57 = vmax.f32 %v1729_v35, 0.0  ;;  %v1153_v31 = vadd.f32 %v3104_v18, %v1152_v28 }
 0x2da   :  { %v1440_v33 = vpop.f32.mrf.mxu3 }
 0x2db   :  { %v974_v37 = vpack.c.bf16 %v939_v40, %v938_v27  ;;  %v1254_v34 = vmax.f32 %v1153_v31, 0.0  ;;  %v1441_v16 = vadd.f32 %v2999_v7, %v1440_v33  ;;  %v3112_v36 = vpack.c.bf16 %v1884_v57, %v1883_v56 }
 0x2dd   :  { %v1569_v39 = vmax.f32 %v1441_v16, 0.0  ;;  %1194 = vmatmul.bf16.gmra.mxu2 %v974_v37  ;;  %v1298_v51 = vpack.c.bf16 %v1254_v34, %v1253_v45 }
 0x2de   :  { %v867_v42 = vpop.f32.mrf.mxu1  ;;  %v1731_v43 = vpop.f32.mrf.mxu0 }
 0x2df   :  { %1482 = vmatmul.bf16.gmra.mxu3 %v1298_v51  ;;  %v1622_v44 = vpack.c.bf16 %v1569_v39, %v1568_v38  ;;  %v868_v50 = vadd.f32 %v3048_v63, %v867_v42  ;;  %v1732_v3 = vadd.f32 %v3087_v49, %v1731_v43 }
 0x2e0   :  { %v1155_v52 = vpop.f32.mrf.mxu2 }
 0x2e1   :  { %1770 = vmatmul.bf16.gmra.mxu0 %v1622_v44  ;;  %v1156_v54 = vadd.f32 %v3104_v18, %v1155_v52  ;;  %v940_v58 = vmax.f32 %v868_v50, 0.0  ;;  %v1885_v60 = vmax.f32 %v1732_v3, 0.0 }
 0x2e2   :  { %v1443_v48 = vpop.f32.mrf.mxu3 }
 0x2e3   :  { %v1444_v2 = vadd.f32 %v2999_v7, %v1443_v48  ;;  %v1255_v55 = vmax.f32 %v1156_v54, 0.0 }
 0x2e5   :  { %v1570_v20 = vmax.f32 %v1444_v2, 0.0 }
 0x2e6   :  { %v869_v26 = vpop.f32.mrf.mxu1  ;;  %v1733_v59 = vpop.f32.mrf.mxu0 }
 0x2e7   :  { %v870_v5 = vadd.f32 %v3048_v63, %v869_v26  ;;  %v1734_v53 = vadd.f32 %v3087_v49, %v1733_v59 }
 0x2e8   :  { %v1157_v0 = vpop.f32.mrf.mxu2 }
 0x2e9   :  { %v941_v61 = vmax.f32 %v870_v5, 0.0  ;;  %v1886_v24 = vmax.f32 %v1734_v53, 0.0  ;;  %v1158_v46 = vadd.f32 %v3104_v18, %v1157_v0 }
 0x2ea   :  { %v1445_v1 = vpop.f32.mrf.mxu3 }
 0x2eb   :  { %v975_v12 = vpack.c.bf16 %v941_v61, %v940_v58  ;;  %v1256_v4 = vmax.f32 %v1158_v46, 0.0  ;;  %v1446_v29 = vadd.f32 %v2999_v7, %v1445_v1  ;;  %v3122_v25 = vpack.c.bf16 %v1886_v24, %v1885_v60 }
 0x2ed   :  { %v1571_v6 = vmax.f32 %v1446_v29, 0.0  ;;  %1199 = vmatmul.bf16.gmra.mxu2 %v975_v12  ;;  %v1299_v9 = vpack.c.bf16 %v1256_v4, %v1255_v55 }
 0x2ee   :  { %v872_v10 = vpop.f32.mrf.mxu1  ;;  %v1736_v13 = vpop.f32.mrf.mxu0 }
 0x2ef   :  { %1487 = vmatmul.bf16.gmra.mxu3 %v1299_v9  ;;  %v1623_v11 = vpack.c.bf16 %v1571_v6, %v1570_v20  ;;  %v873_v47 = vadd.f32 %v3048_v63, %v872_v10  ;;  %v1737_v15 = vadd.f32 %v3087_v49, %v1736_v13 }
 0x2f0   :  { %v1160_v14 = vpop.f32.mrf.mxu2 }
 0x2f1   :  { %1775 = vmatmul.bf16.gmra.mxu0 %v1623_v11  ;;  %v1161_v62 = vadd.f32 %v3104_v18, %v1160_v14  ;;  %v942_v23 = vmax.f32 %v873_v47, 0.0  ;;  %v1887_v17 = vmax.f32 %v1737_v15, 0.0 }
 0x2f2   :  { %v1448_v30 = vpop.f32.mrf.mxu3 }
 0x2f3   :  { %v1449_v27 = vadd.f32 %v2999_v7, %v1448_v30  ;;  %v1257_v40 = vmax.f32 %v1161_v62, 0.0 }
 0x2f5   :  { %v1572_v34 = vmax.f32 %v1449_v27, 0.0 }
 0x2f6   :  { %v874_v32 = vpop.f32.mrf.mxu1  ;;  %v1738_v8 = vpop.f32.mrf.mxu0 }
 0x2f7   :  { %v875_v21 = vadd.f32 %v3048_v63, %v874_v32  ;;  %v1739_v22 = vadd.f32 %v3087_v49, %v1738_v8 }
 0x2f8   :  { %v1162_v35 = vpop.f32.mrf.mxu2 }
 0x2f9   :  { %v943_v56 = vmax.f32 %v875_v21, 0.0  ;;  %v1888_v28 = vmax.f32 %v1739_v22, 0.0  ;;  %v1163_v41 = vadd.f32 %v3104_v18, %v1162_v35 }
 0x2fa   :  { %v1450_v57 = vpop.f32.mrf.mxu3 }
 0x2fb   :  { %v976_v31 = vpack.c.bf16 %v943_v56, %v942_v23  ;;  %v1258_v45 = vmax.f32 %v1163_v41, 0.0  ;;  %v1451_v33 = vadd.f32 %v2999_v7, %v1450_v57  ;;  %v3132_v37 = vpack.c.bf16 %v1888_v28, %v1887_v17 }
 0x2fd   :  { %v1300_v16 = vpack.c.bf16 %v1258_v45, %v1257_v40  ;;  %v1573_v38 = vmax.f32 %v1451_v33, 0.0  ;;  %1204 = vmatmul.bf16.gmra.mxu2 %v976_v31 }
 0x2fe   :  { %v877_v39 = vpop.f32.mrf.mxu1  ;;  %v1741_v51 = vpop.f32.mrf.mxu0 }
 0x2ff   :  { %1492 = vmatmul.bf16.gmra.mxu3 %v1300_v16  ;;  %v1624_v42 = vpack.c.bf16 %v1573_v38, %v1572_v34  ;;  %v878_v52 = vadd.f32 %v3048_v63, %v877_v39  ;;  %v1742_v48 = vadd.f32 %v3087_v49, %v1741_v51 }
 0x300   :  { %v1165_v43 = vpop.f32.mrf.mxu2 }
 0x301   :  { %1780 = vmatmul.bf16.gmra.mxu0 %v1624_v42  ;;  %v1166_v50 = vadd.f32 %v3104_v18, %v1165_v43  ;;  %v944_v5 = vmax.f32 %v878_v52, 0.0  ;;  %v1889_v53 = vmax.f32 %v1742_v48, 0.0 }
 0x302   :  { %v1453_v44 = vpop.f32.mrf.mxu3 }
 0x303   :  { %v1454_v60 = vadd.f32 %v2999_v7, %v1453_v44  ;;  %v1259_v24 = vmax.f32 %v1166_v50, 0.0 }
 0x306   :  { %v879_v3 = vpop.f32.mrf.mxu1  ;;  %v1743_v54 = vpop.f32.mrf.mxu0 }
 0x307   :  { %v880_v26 = vadd.f32 %v3048_v63, %v879_v3  ;;  %v1744_v59 = vadd.f32 %v3087_v49, %v1743_v54  ;;  %v1574_v63 = vmax.f32 %v1454_v60, 0.0 }
 0x308   :  { %v1167_v58 = vpop.f32.mrf.mxu2 }
 0x309   :  { %v945_v0 = vmax.f32 %v880_v26, 0.0  ;;  %v1890_v2 = vmax.f32 %v1744_v59, 0.0  ;;  %v1168_v61 = vadd.f32 %v3104_v18, %v1167_v58 }
 0x30a   :  { %v1455_v46 = vpop.f32.mrf.mxu3 }
 0x30b   :  { %v977_v55 = vpack.c.bf16 %v945_v0, %v944_v5  ;;  %v1260_v1 = vmax.f32 %v1168_v61, 0.0  ;;  %v1456_v12 = vadd.f32 %v2999_v7, %v1455_v46  ;;  %v3142_v4 = vpack.c.bf16 %v1890_v2, %v1889_v53 }
 0x30d   :  { %v1301_v29 = vpack.c.bf16 %v1260_v1, %v1259_v24  ;;  %v1575_v20 = vmax.f32 %v1456_v12, 0.0  ;;  %1209 = vmatmul.bf16.gmra.mxu2 %v977_v55 }
 0x30e   :  { %v3144_v6 = vpop.f32.mrf.mxu0 }
 0x30f   :  { %1497 = vmatmul.bf16.gmra.mxu3 %v1301_v29  ;;  %v1625_v9 = vpack.c.bf16 %v1575_v20, %v1574_v63 }
 0x310   :  { %v1170_v10 = vpop.f32.mrf.mxu2 }
 0x311   :  { %1785 = vmatmul.bf16.gmra.mxu0 %v1625_v9  ;;  %v1171_v14 = vadd.f32 %v3104_v18, %v1170_v10 }
 0x312   :  { %v1458_v13 = vpop.f32.mrf.mxu3 }
 0x313   :  { %v1459_v47 = vadd.f32 %v2999_v7, %v1458_v13  ;;  %v1261_v32 = vmax.f32 %v1171_v14, 0.0 }
 0x315   :  { %v1576_v22 = vmax.f32 %v1459_v47, 0.0 }
 0x316   :  { %v3146_v11 = vpop.f32.mrf.mxu0 }
 0x318   :  { %v1172_v30 = vpop.f32.mrf.mxu2 }
 0x319   :  { %v1173_v15 = vadd.f32 %v3104_v18, %v1172_v30  ;;  %v1749_v30 = vadd.f32 %v3087_v49, %v3146_v11 }
 0x31a   :  { %v1460_v62 = vpop.f32.mrf.mxu3 }
 0x31b   :  { %v1262_v8 = vmax.f32 %v1173_v15, 0.0  ;;  %v1461_v21 = vadd.f32 %v2999_v7, %v1460_v62  ;;  %v1747_v62 = vadd.f32 %v3087_v49, %v3144_v6 }
 0x31d   :  { %v1302_v23 = vpack.c.bf16 %v1262_v8, %v1261_v32  ;;  %v1577_v17 = vmax.f32 %v1461_v21, 0.0  ;;  %v1892_v8 = vmax.f32 %v1749_v30, 0.0 }
 0x31e   :  { %v1751_v35 = vpop.f32.mrf.mxu0 }
 0x31f   :  { %1502 = vmatmul.bf16.gmra.mxu3 %v1302_v23  ;;  %v1626_v27 = vpack.c.bf16 %v1577_v17, %v1576_v22  ;;  %v1752_v1 = vadd.f32 %v3087_v49, %v1751_v35  ;;  %v1891_v17 = vmax.f32 %v1747_v62, 0.0 }
 0x320   :  { %v1175_v56 = vpop.f32.mrf.mxu2 }
 0x321   :  { %1790 = vmatmul.bf16.gmra.mxu0 %v1626_v27  ;;  %v1176_v40 = vadd.f32 %v3104_v18, %v1175_v56  ;;  %v1893_v14 = vmax.f32 %v1752_v1, 0.0 }
 0x322   :  { %v1463_v28 = vpop.f32.mrf.mxu3 }
 0x323   :  { %v1464_v31 = vadd.f32 %v2999_v7, %v1463_v28  ;;  %v1263_v34 = vmax.f32 %v1176_v40, 0.0  ;;  %v1950_v40 = vpack.c.bf16 %v1892_v8, %v1891_v17 }
 0x325   :  { %v1578_v39 = vmax.f32 %v1464_v31, 0.0 }
 0x326   :  { %v1753_v41 = vpop.f32.mrf.mxu0 }
 0x327   :  { %v1754_v0 = vadd.f32 %v3087_v49, %v1753_v41 }
 0x328   :  { %v1177_v57 = vpop.f32.mrf.mxu2 }
 0x329   :  { %v1178_v45 = vadd.f32 %v3104_v18, %v1177_v57  ;;  %v1894_v9 = vmax.f32 %v1754_v0, 0.0 }
 0x32a   :  { %v1465_v33 = vpop.f32.mrf.mxu3 }
 0x32b   :  { %v1264_v16 = vmax.f32 %v1178_v45, 0.0  ;;  %v1466_v38 = vadd.f32 %v2999_v7, %v1465_v33  ;;  %v1951_v15 = vpack.c.bf16 %v1894_v9, %v1893_v14 }
 0x32d   :  { %v1303_v51 = vpack.c.bf16 %v1264_v16, %v1263_v34  ;;  %v1579_v42 = vmax.f32 %v1466_v38, 0.0 }
 0x32e   :  { %v1756_v43 = vpop.f32.mrf.mxu0 }
 0x32f   :  { %1507 = vmatmul.bf16.gmra.mxu3 %v1303_v51  ;;  %v1627_v44 = vpack.c.bf16 %v1579_v42, %v1578_v39  ;;  %v1757_v50 = vadd.f32 %v3087_v49, %v1756_v43 }
 0x330   :  { %v1180_v52 = vpop.f32.mrf.mxu2 }
 0x331   :  { %1795 = vmatmul.bf16.gmra.mxu0 %v1627_v44  ;;  %v1181_v54 = vadd.f32 %v3104_v18, %v1180_v52  ;;  %v1895_v5 = vmax.f32 %v1757_v50, 0.0 }
 0x332   :  { %v1468_v48 = vpop.f32.mrf.mxu3 }
 0x333   :  { %v1469_v53 = vadd.f32 %v2999_v7, %v1468_v48  ;;  %v1265_v61 = vmax.f32 %v1181_v54, 0.0 }
 0x335   :  { %v1580_v12 = vmax.f32 %v1469_v53, 0.0 }
 0x336   :  { %v1758_v3 = vpop.f32.mrf.mxu0 }
 0x337   :  { %v1759_v26 = vadd.f32 %v3087_v49, %v1758_v3 }
 0x338   :  { %v1182_v59 = vpop.f32.mrf.mxu2 }
 0x339   :  { %v1896_v58 = vmax.f32 %v1759_v26, 0.0  ;;  %v1183_v60 = vadd.f32 %v3104_v18, %v1182_v59 }
 0x33a   :  { %v1470_v2 = vpop.f32.mrf.mxu3 }
 0x33b   :  { %v1952_v24 = vpack.c.bf16 %v1896_v58, %v1895_v5  ;;  %v1266_v46 = vmax.f32 %v1183_v60, 0.0  ;;  %v1471_v55 = vadd.f32 %v2999_v7, %v1470_v2 }
 0x33d   :  { %v1304_v63 = vpack.c.bf16 %v1266_v46, %v1265_v61  ;;  %v1581_v29 = vmax.f32 %v1471_v55, 0.0  ;;  %1980 = vmatpush.bf16.xpose.msra.mxu1 %v1952_v24 }
 0x33e   :  { %v1761_v20 = vpop.f32.mrf.mxu0 }
 0x33f   :  { %1512 = vmatmul.bf16.gmra.mxu3 %v1304_v63  ;;  %v1628_v10 = vpack.c.bf16 %v1581_v29, %v1580_v12  ;;  %v1762_v32 = vadd.f32 %v3087_v49, %v1761_v20 }
 0x340   :  { %v1185_v13 = vpop.f32.mrf.mxu2 }
 0x341   :  { %1800 = vmatmul.bf16.gmra.mxu0 %v1628_v10  ;;  %v1186_v22 = vadd.f32 %v3104_v18, %v1185_v13  ;;  %v1897_v27 = vmax.f32 %v1762_v32, 0.0 }
 0x342   :  { %v1473_v47 = vpop.f32.mrf.mxu3 }
 0x343   :  { %v1474_v56 = vadd.f32 %v2999_v7, %v1473_v47  ;;  %v1267_v6 = vmax.f32 %v1186_v22, 0.0 }
 0x345   :  { %1981 = vmatpush.bf16.xpose.msra.mxu1 %v1951_v15  ;;  %v1582_v33 = vmax.f32 %v1474_v56, 0.0 }
 0x346   :  { %v1763_v21 = vpop.f32.mrf.mxu0 }
 0x347   :  { %v1764_v23 = vadd.f32 %v3087_v49, %v1763_v21 }
 0x348   :  { %v1187_v35 = vpop.f32.mrf.mxu2 }
 0x349   :  { %v1898_v11 = vmax.f32 %v1764_v23, 0.0  ;;  %v1188_v28 = vadd.f32 %v3104_v18, %v1187_v35 }
 0x34a   :  { %v1475_v41 = vpop.f32.mrf.mxu3 }
 0x34b   :  { %v1268_v57 = vmax.f32 %v1188_v28, 0.0  ;;  %v1476_v31 = vadd.f32 %v2999_v7, %v1475_v41  ;;  %v3174_v45 = vpack.c.bf16 %v1898_v11, %v1897_v27 }
 0x34d   :  { %v1305_v34 = vpack.c.bf16 %v1268_v57, %v1267_v6  ;;  %v1583_v16 = vmax.f32 %v1476_v31, 0.0  ;;  %1982 = vmatpush.bf16.xpose.msra.mxu1 %v1950_v40 }
 0x34e   :  { %v1766_v38 = vpop.f32.mrf.mxu0 }
 0x34f   :  { %1517 = vmatmul.bf16.gmra.mxu3 %v1305_v34  ;;  %v1629_v39 = vpack.c.bf16 %v1583_v16, %v1582_v33  ;;  %v1767_v43 = vadd.f32 %v3087_v49, %v1766_v38 }
 0x350   :  { %v1190_v51 = vpop.f32.mrf.mxu2 }
 0x351   :  { %1805 = vmatmul.bf16.gmra.mxu0 %v1629_v39  ;;  %v1191_v52 = vadd.f32 %v3104_v18, %v1190_v51  ;;  %v1899_v3 = vmax.f32 %v1767_v43, 0.0 }
 0x352   :  { %v1478_v42 = vpop.f32.mrf.mxu3 }
 0x353   :  { %v1479_v54 = vadd.f32 %v2999_v7, %v1478_v42  ;;  %v1269_v53 = vmax.f32 %v1191_v52, 0.0 }
 0x355   :  { %1983 = vmatpush.bf16.xpose.msra.mxu1 %v3142_v4  ;;  %v1584_v4 = vmax.f32 %v1479_v54, 0.0 }
 0x356   :  { %v1768_v44 = vpop.f32.mrf.mxu0 }
 0x357   :  { %v1769_v48 = vadd.f32 %v3087_v49, %v1768_v44 }
 0x358   :  { %v1192_v50 = vpop.f32.mrf.mxu2 }
 0x359   :  { %v1900_v26 = vmax.f32 %v1769_v48, 0.0  ;;  %v1193_v59 = vadd.f32 %v3104_v18, %v1192_v50 }
 0x35a   :  { %v1480_v5 = vpop.f32.mrf.mxu3 }
 0x35b   :  { %v1270_v58 = vmax.f32 %v1193_v59, 0.0  ;;  %v1481_v60 = vadd.f32 %v2999_v7, %v1480_v5  ;;  %v3183_v0 = vpack.c.bf16 %v1900_v26, %v1899_v3 }
 0x35d   :  { %v1306_v2 = vpack.c.bf16 %v1270_v58, %v1269_v53  ;;  %v1585_v61 = vmax.f32 %v1481_v60, 0.0  ;;  %1984 = vmatpush.bf16.xpose.msra.mxu1 %v3132_v37  ;;  %v3193_v37 = vld [vmem:[%s3320_s8] ss:$0 sm:$0xff] }
 0x35e   :  { %v1771_v24 = vpop.f32.mrf.mxu0 }
 0x35f   :  { %1522 = vmatmul.bf16.gmra.mxu3 %v1306_v2  ;;  %v1630_v46 = vpack.c.bf16 %v1585_v61, %v1584_v4  ;;  %v1772_v12 = vadd.f32 %v3087_v49, %v1771_v24 }
 0x360   :  { %v1195_v55 = vpop.f32.mrf.mxu2 }
 0x361   :  { %1810 = vmatmul.bf16.gmra.mxu0 %v1630_v46  ;;  %v1196_v7 = vadd.f32 %v3104_v18, %v1195_v55  ;;  %v1901_v9 = vmax.f32 %v1772_v12, 0.0 }
 0x362   :  { %v1483_v1 = vpop.f32.mrf.mxu3 }
 0x363   :  { %v1484_v10 = vadd.f32 %v3193_v37, %v1483_v1  ;;  %v1271_v47 = vmax.f32 %v1196_v7, 0.0 }
 0x365   :  { %1985 = vmatpush.bf16.xpose.msra.mxu1 %v3122_v25  ;;  %v1586_v32 = vmax.f32 %v1484_v10, 0.0 }
 0x366   :  { %v1773_v63 = vpop.f32.mrf.mxu0 }
 0x367   :  { %v1774_v29 = vadd.f32 %v3087_v49, %v1773_v63 }
 0x368   :  { %v1197_v20 = vpop.f32.mrf.mxu2 }
 0x369   :  { %v1902_v13 = vmax.f32 %v1774_v29, 0.0  ;;  %v1198_v14 = vadd.f32 %v3104_v18, %v1197_v20 }
 0x36a   :  { %v1485_v30 = vpop.f32.mrf.mxu3 }
 0x36b   :  { %v1272_v25 = vmax.f32 %v1198_v14, 0.0  ;;  %v1486_v15 = vadd.f32 %v3193_v37, %v1485_v30  ;;  %v3198_v62 = vpack.c.bf16 %v1902_v13, %v1901_v9 }
 0x36d   :  { %v1307_v8 = vpack.c.bf16 %v1272_v25, %v1271_v47  ;;  %v1587_v21 = vmax.f32 %v1486_v15, 0.0  ;;  %1986 = vmatpush.bf16.xpose.msra.mxu1 %v3112_v36 }
 0x36e   :  { %v1776_v22 = vpop.f32.mrf.mxu0 }
 0x36f   :  { %1527 = vmatmul.bf16.gmra.mxu3 %v1307_v8  ;;  %v1631_v23 = vpack.c.bf16 %v1587_v21, %v1586_v32  ;;  %v1777_v27 = vadd.f32 %v3087_v49, %v1776_v22 }
 0x370   :  { %v1200_v17 = vpop.f32.mrf.mxu2 }
 0x371   :  { %1815 = vmatmul.bf16.gmra.mxu0 %v1631_v23  ;;  %v1201_v11 = vadd.f32 %v3104_v18, %v1200_v17  ;;  %v1903_v40 = vmax.f32 %v1777_v27, 0.0 }
 0x372   :  { %v1488_v35 = vpop.f32.mrf.mxu3 }
 0x373   :  { %v1489_v6 = vadd.f32 %v3193_v37, %v1488_v35  ;;  %v1273_v33 = vmax.f32 %v1201_v11, 0.0 }
 0x375   :  { %1987 = vmatpush.bf16.xpose.msra.mxu1 %v3097_v19  ;;  %v1588_v19 = vmax.f32 %v1489_v6, 0.0 }
 0x376   :  { %v1778_v56 = vpop.f32.mrf.mxu0 }
 0x377   :  { %v1779_v28 = vadd.f32 %v3087_v49, %v1778_v56 }
 0x378   :  { %v1202_v41 = vpop.f32.mrf.mxu2 }
 0x379   :  { %v1904_v36 = vmax.f32 %v1779_v28, 0.0  ;;  %v1203_v57 = vadd.f32 %v3104_v18, %v1202_v41 }
 0x37a   :  { %v1490_v31 = vpop.f32.mrf.mxu3 }
 0x37b   :  { %v1274_v34 = vmax.f32 %v1203_v57, 0.0  ;;  %v1491_v16 = vadd.f32 %v3193_v37, %v1490_v31  ;;  %v3208_v38 = vpack.c.bf16 %v1904_v36, %v1903_v40 }
 0x37d   :  { %v1308_v39 = vpack.c.bf16 %v1274_v34, %v1273_v33  ;;  %v1589_v51 = vmax.f32 %v1491_v16, 0.0 }
 0x37e   :  { %v1781_v42 = vpop.f32.mrf.mxu0 }
 0x37f   :  { %1532 = vmatmul.bf16.gmra.mxu3 %v1308_v39  ;;  %v1632_v43 = vpack.c.bf16 %v1589_v51, %v1588_v19  ;;  %v1782_v48 = vadd.f32 %v3087_v49, %v1781_v42 }
 0x380   :  { %v1205_v44 = vpop.f32.mrf.mxu2 }
 0x381   :  { %1820 = vmatmul.bf16.gmra.mxu0 %v1632_v43  ;;  %v1206_v3 = vadd.f32 %v3104_v18, %v1205_v44  ;;  %v1905_v59 = vmax.f32 %v1782_v48, 0.0 }
 0x382   :  { %v1493_v52 = vpop.f32.mrf.mxu3 }
 0x383   :  { %v1494_v5 = vadd.f32 %v3193_v37, %v1493_v52  ;;  %v1275_v4 = vmax.f32 %v1206_v3, 0.0 }
 0x385   :  { %v1590_v46 = vmax.f32 %v1494_v5, 0.0 }
 0x386   :  { %v1783_v50 = vpop.f32.mrf.mxu0 }
 0x387   :  { %v1784_v54 = vadd.f32 %v3087_v49, %v1783_v50 }
 0x388   :  { %v1207_v26 = vpop.f32.mrf.mxu2 }
 0x389   :  { %v1906_v53 = vmax.f32 %v1784_v54, 0.0  ;;  %v1208_v58 = vadd.f32 %v3104_v18, %v1207_v26 }
 0x38a   :  { %v1495_v60 = vpop.f32.mrf.mxu3 }
 0x38b   :  { %v1276_v2 = vmax.f32 %v1208_v58, 0.0  ;;  %v1496_v61 = vadd.f32 %v3193_v37, %v1495_v60  ;;  %v3216_v24 = vpack.c.bf16 %v1906_v53, %v1905_v59 }
 0x38d   :  { %v1309_v55 = vpack.c.bf16 %v1276_v2, %v1275_v4  ;;  %v1591_v1 = vmax.f32 %v1496_v61, 0.0 }
 0x38e   :  { %v1786_v12 = vpop.f32.mrf.mxu0 }
 0x38f   :  { %v1633_v63 = vpack.c.bf16 %v1591_v1, %v1590_v46  ;;  %1537 = vmatmul.bf16.gmra.mxu3 %v1309_v55  ;;  %v1787_v53 = vadd.f32 %v3087_v49, %v1786_v12 }
 0x390   :  { %v1210_v7 = vpop.f32.mrf.mxu2 }
 0x391   :  { %1825 = vmatmul.bf16.gmra.mxu0 %v1633_v63  ;;  %v1211_v9 = vadd.f32 %v3104_v18, %v1210_v7  ;;  %v1907_v61 = vmax.f32 %v1787_v53, 0.0 }
 0x392   :  { %v1498_v29 = vpop.f32.mrf.mxu3 }
 0x393   :  { %v1499_v13 = vadd.f32 %v3193_v37, %v1498_v29  ;;  %v1277_v47 = vmax.f32 %v1211_v9, 0.0 }
 0x395   :  { %v1592_v32 = vmax.f32 %v1499_v13, 0.0 }
 0x396   :  { %v1788_v20 = vpop.f32.mrf.mxu0 }
 0x397   :  { %v1789_v59 = vadd.f32 %v3087_v49, %v1788_v20 }
 0x398   :  { %v1212_v10 = vpop.f32.mrf.mxu2 }
 0x399   :  { %v1213_v14 = vadd.f32 %v3104_v18, %v1212_v10  ;;  %v1908_v4 = vmax.f32 %v1789_v59, 0.0 }
 0x39a   :  { %v1500_v30 = vpop.f32.mrf.mxu3 }
 0x39b   :  { %v1278_v25 = vmax.f32 %v1213_v14, 0.0  ;;  %v1501_v15 = vadd.f32 %v3193_v37, %v1500_v30  ;;  %v1958_v29 = vpack.c.bf16 %v1908_v4, %v1907_v61 }
 0x39d   :  { %v1310_v8 = vpack.c.bf16 %v1278_v25, %v1277_v47  ;;  %v1593_v21 = vmax.f32 %v1501_v15, 0.0 }
 0x39e   :  { %v1791_v22 = vpop.f32.mrf.mxu0 }
 0x39f   :  { %v1634_v23 = vpack.c.bf16 %v1593_v21, %v1592_v32  ;;  %1542 = vmatmul.bf16.gmra.mxu3 %v1310_v8  ;;  %v1792_v43 = vadd.f32 %v3087_v49, %v1791_v22 }
 0x3a1   :  { %1830 = vmatmul.bf16.gmra.mxu0 %v1634_v23  ;;  %v1909_v54 = vmax.f32 %v1792_v43, 0.0 }
 0x3a2   :  { %v1503_v17 = vpop.f32.mrf.mxu3 }
 0x3a3   :  { %v1504_v27 = vadd.f32 %v3193_v37, %v1503_v17 }
 0x3a5   :  { %v1594_v18 = vmax.f32 %v1504_v27, 0.0 }
 0x3a6   :  { %v1793_v35 = vpop.f32.mrf.mxu0 }
 0x3a7   :  { %v1794_v39 = vadd.f32 %v3087_v49, %v1793_v35 }
 0x3a9   :  { %v1910_v50 = vmax.f32 %v1794_v39, 0.0 }
 0x3aa   :  { %v1505_v56 = vpop.f32.mrf.mxu3 }
 0x3ab   :  { %v1506_v11 = vadd.f32 %v3193_v37, %v1505_v56  ;;  %v1959_v5 = vpack.c.bf16 %v1910_v50, %v1909_v54 }
 0x3ad   :  { %v1595_v28 = vmax.f32 %v1506_v11, 0.0 }
 0x3ae   :  { %v1796_v41 = vpop.f32.mrf.mxu0 }
 0x3af   :  { %v1635_v40 = vpack.c.bf16 %v1595_v28, %v1594_v18  ;;  %v1797_v36 = vadd.f32 %v3087_v49, %v1796_v41 }
 0x3b1   :  { %1835 = vmatmul.bf16.gmra.mxu0 %v1635_v40  ;;  %v1911_v33 = vmax.f32 %v1797_v36, 0.0 }
 0x3b2   :  { %v1508_v6 = vpop.f32.mrf.mxu3 }
 0x3b3   :  { %v1509_v34 = vadd.f32 %v3193_v37, %v1508_v6 }
 0x3b5   :  { %v1596_v44 = vmax.f32 %v1509_v34, 0.0 }
 0x3b6   :  { %v1798_v57 = vpop.f32.mrf.mxu0 }
 0x3b7   :  { %v1799_v31 = vadd.f32 %v3087_v49, %v1798_v57 }
 0x3b9   :  { %v1912_v16 = vmax.f32 %v1799_v31, 0.0 }
 0x3ba   :  { %v1510_v19 = vpop.f32.mrf.mxu3 }
 0x3bb   :  { %v1960_v51 = vpack.c.bf16 %v1912_v16, %v1911_v33  ;;  %v1511_v42 = vadd.f32 %v3193_v37, %v1510_v19 }
 0x3bd   :  { %v1597_v52 = vmax.f32 %v1511_v42, 0.0  ;;  %1993 = vmatpush.bf16.xpose.msra.mxu2 %v1960_v51 }
 0x3be   :  { %v1801_v48 = vpop.f32.mrf.mxu0 }
 0x3bf   :  { %v1636_v3 = vpack.c.bf16 %v1597_v52, %v1596_v44  ;;  %v1802_v58 = vadd.f32 %v3087_v49, %v1801_v48 }
 0x3c1   :  { %1840 = vmatmul.bf16.gmra.mxu0 %v1636_v3  ;;  %v1913_v46 = vmax.f32 %v1802_v58, 0.0 }
 0x3c2   :  { %v1513_v26 = vpop.f32.mrf.mxu3 }
 0x3c3   :  { %v1514_v55 = vadd.f32 %v3193_v37, %v1513_v26 }
 0x3c5   :  { %1994 = vmatpush.bf16.xpose.msra.mxu2 %v1959_v5  ;;  %v1598_v9 = vmax.f32 %v1514_v55, 0.0 }
 0x3c6   :  { %v1803_v60 = vpop.f32.mrf.mxu0 }
 0x3c7   :  { %v1804_v2 = vadd.f32 %v3087_v49, %v1803_v60 }
 0x3c9   :  { %v1914_v1 = vmax.f32 %v1804_v2, 0.0 }
 0x3ca   :  { %v1515_v63 = vpop.f32.mrf.mxu3 }
 0x3cb   :  { %v1516_v7 = vadd.f32 %v3193_v37, %v1515_v63  ;;  %v3236_v20 = vpack.c.bf16 %v1914_v1, %v1913_v46 }
 0x3cd   :  { %v1599_v12 = vmax.f32 %v1516_v7, 0.0  ;;  %1995 = vmatpush.bf16.xpose.msra.mxu2 %v1958_v29 }
 0x3ce   :  { %v1806_v10 = vpop.f32.mrf.mxu0 }
 0x3cf   :  { %v1637_v13 = vpack.c.bf16 %v1599_v12, %v1598_v9  ;;  %v1807_v30 = vadd.f32 %v3087_v49, %v1806_v10 }
 0x3d1   :  { %1845 = vmatmul.bf16.gmra.mxu0 %v1637_v13  ;;  %v1915_v15 = vmax.f32 %v1807_v30, 0.0 }
 0x3d2   :  { %v1518_v14 = vpop.f32.mrf.mxu3 }
 0x3d3   :  { %v1519_v32 = vadd.f32 %v3193_v37, %v1518_v14 }
 0x3d5   :  { %1996 = vmatpush.bf16.xpose.msra.mxu2 %v3216_v24  ;;  %v1600_v17 = vmax.f32 %v1519_v32, 0.0 }
 0x3d6   :  { %v1808_v47 = vpop.f32.mrf.mxu0 }
 0x3d7   :  { %v1809_v25 = vadd.f32 %v3087_v49, %v1808_v47 }
 0x3d9   :  { %v1916_v8 = vmax.f32 %v1809_v25, 0.0 }
 0x3da   :  { %v1520_v21 = vpop.f32.mrf.mxu3 }
 0x3db   :  { %v1521_v22 = vadd.f32 %v3193_v37, %v1520_v21  ;;  %v3243_v23 = vpack.c.bf16 %v1916_v8, %v1915_v15 }
 0x3dd   :  { %v1601_v35 = vmax.f32 %v1521_v22, 0.0  ;;  %1997 = vmatpush.bf16.xpose.msra.mxu2 %v3208_v38 }
 0x3de   :  { %v1811_v27 = vpop.f32.mrf.mxu0 }
 0x3df   :  { %v1638_v56 = vpack.c.bf16 %v1601_v35, %v1600_v17  ;;  %v1812_v11 = vadd.f32 %v3087_v49, %v1811_v27 }
 0x3e1   :  { %1850 = vmatmul.bf16.gmra.mxu0 %v1638_v56  ;;  %v1917_v41 = vmax.f32 %v1812_v11, 0.0 }
 0x3e2   :  { %v1523_v24 = vpop.f32.mrf.mxu3 }
 0x3e3   :  { %v1524_v40 = vadd.f32 %v3193_v37, %v1523_v24 }
 0x3e5   :  { %1998 = vmatpush.bf16.xpose.msra.mxu2 %v3198_v62  ;;  %v1602_v38 = vmax.f32 %v1524_v40, 0.0 }
 0x3e6   :  { %v1813_v18 = vpop.f32.mrf.mxu0 }
 0x3e7   :  { %v1814_v28 = vadd.f32 %v3087_v49, %v1813_v18 }
 0x3e9   :  { %v1918_v6 = vmax.f32 %v1814_v28, 0.0 }
 0x3ea   :  { %v1525_v36 = vpop.f32.mrf.mxu3 }
 0x3eb   :  { %v1526_v57 = vadd.f32 %v3193_v37, %v1525_v36  ;;  %v3251_v31 = vpack.c.bf16 %v1918_v6, %v1917_v41 }
 0x3ed   :  { %v1603_v33 = vmax.f32 %v1526_v57, 0.0  ;;  %1999 = vmatpush.bf16.xpose.msra.mxu2 %v3183_v0 }
 0x3ee   :  { %v1816_v34 = vpop.f32.mrf.mxu0 }
 0x3ef   :  { %v1639_v16 = vpack.c.bf16 %v1603_v33, %v1602_v38  ;;  %v1817_v19 = vadd.f32 %v3087_v49, %v1816_v34  ;;  %v3276_v33 = vld [vmem:[%s3322_s10] ss:$0 sm:$0xff] }
 0x3f1   :  { %1855 = vmatmul.bf16.gmra.mxu0 %v1639_v16  ;;  %v1919_v42 = vmax.f32 %v1817_v19, 0.0 }
 0x3f2   :  { %v1528_v62 = vpop.f32.mrf.mxu3 }
 0x3f3   :  { %v1529_v43 = vadd.f32 %v3193_v37, %v1528_v62 }
 0x3f5   :  { %2000 = vmatpush.bf16.xpose.msra.mxu2 %v3174_v45  ;;  %v1604_v0 = vmax.f32 %v1529_v43, 0.0 }
 0x3f6   :  { %v1818_v39 = vpop.f32.mrf.mxu0 }
 0x3f7   :  { %v1819_v51 = vadd.f32 %v3087_v49, %v1818_v39 }
 0x3f9   :  { %v1920_v44 = vmax.f32 %v1819_v51, 0.0 }
 0x3fa   :  { %v1530_v52 = vpop.f32.mrf.mxu3 }
 0x3fb   :  { %v1531_v48 = vadd.f32 %v3193_v37, %v1530_v52  ;;  %v3259_v50 = vpack.c.bf16 %v1920_v44, %v1919_v42 }
 0x3fd   :  { %v1605_v3 = vmax.f32 %v1531_v48, 0.0 }
 0x3fe   :  { %v1821_v54 = vpop.f32.mrf.mxu0 }
 0x3ff   :  { %v1640_v26 = vpack.c.bf16 %v1605_v3, %v1604_v0  ;;  %v1822_v45 = vadd.f32 %v3087_v49, %v1821_v54 }
 0x401   :  { %1860 = vmatmul.bf16.gmra.mxu0 %v1640_v26  ;;  %v1921_v58 = vmax.f32 %v1822_v45, 0.0 }
 0x402   :  { %v1533_v59 = vpop.f32.mrf.mxu3 }
 0x403   :  { %v1534_v60 = vadd.f32 %v3193_v37, %v1533_v59 }
 0x405   :  { %v1606_v55 = vmax.f32 %v1534_v60, 0.0 }
 0x406   :  { %v1823_v5 = vpop.f32.mrf.mxu0 }
 0x407   :  { %v1824_v53 = vadd.f32 %v3087_v49, %v1823_v5 }
 0x409   :  { %v1922_v4 = vmax.f32 %v1824_v53, 0.0 }
 0x40a   :  { %v1535_v2 = vpop.f32.mrf.mxu3 }
 0x40b   :  { %v1965_v61 = vpack.c.bf16 %v1922_v4, %v1921_v58  ;;  %v1536_v46 = vadd.f32 %v3193_v37, %v1535_v2 }
 0x40d   :  { %v1607_v1 = vmax.f32 %v1536_v46, 0.0 }
 0x40e   :  { %v1826_v63 = vpop.f32.mrf.mxu0 }
 0x40f   :  { %v1641_v7 = vpack.c.bf16 %v1607_v1, %v1606_v55  ;;  %v1827_v62 = vadd.f32 %v3276_v33, %v1826_v63 }
 0x411   :  { %1865 = vmatmul.bf16.gmra.mxu0 %v1641_v7  ;;  %v1923_v42 = vmax.f32 %v1827_v62, 0.0 }
 0x412   :  { %v1538_v29 = vpop.f32.mrf.mxu3 }
 0x413   :  { %v1539_v12 = vadd.f32 %v3193_v37, %v1538_v29 }
 0x415   :  { %v1608_v14 = vmax.f32 %v1539_v12, 0.0 }
 0x416   :  { %v1828_v9 = vpop.f32.mrf.mxu0 }
 0x417   :  { %v1829_v34 = vadd.f32 %v3276_v33, %v1828_v9 }
 0x419   :  { %v1924_v51 = vmax.f32 %v1829_v34, 0.0 }
 0x41a   :  { %v1540_v10 = vpop.f32.mrf.mxu3 }
 0x41b   :  { %v1541_v13 = vadd.f32 %v3193_v37, %v1540_v10  ;;  %v1966_v52 = vpack.c.bf16 %v1924_v51, %v1923_v42 }
 0x41d   :  { %v1609_v30 = vmax.f32 %v1541_v13, 0.0 }
 0x41e   :  { %v1831_v47 = vpop.f32.mrf.mxu0 }
 0x41f   :  { %v1642_v25 = vpack.c.bf16 %v1609_v30, %v1608_v14  ;;  %v1832_v36 = vadd.f32 %v3087_v49, %v1831_v47 }
 0x421   :  { %1870 = vmatmul.bf16.gmra.mxu0 %v1642_v25  ;;  %v1925_v38 = vmax.f32 %v1832_v36, 0.0 }
 0x422   :  { %v1543_v15 = vpop.f32.mrf.mxu3 }
 0x423   :  { %v1544_v8 = vadd.f32 %v3193_v37, %v1543_v15 }
 0x425   :  { %v1610_v17 = vmax.f32 %v1544_v8, 0.0 }
 0x426   :  { %v1833_v32 = vpop.f32.mrf.mxu0 }
 0x427   :  { %v1834_v40 = vadd.f32 %v3087_v49, %v1833_v32 }
 0x42a   :  { %v1545_v21 = vpop.f32.mrf.mxu3 }
 0x42b   :  { %v1546_v22 = vadd.f32 %v3193_v37, %v1545_v21  ;;  %v1926_v37 = vmax.f32 %v1834_v40, 0.0  ;;  %v1977_v40 = vld [vmem:[%s3323_s11] sm:$0x1] }
 0x42c   :  { %1988 = vmatmul.bf16.vlgmr.msra.gmra.mxu1 %v1977_v40  ;;  %2001 = vmatmul.bf16.vlgmr.msra.gmra.mxu2 %v1977_v40 }
 0x42d   :  { %v1611_v35 = vmax.f32 %v1546_v22, 0.0  ;;  %v1967_v16 = vpack.c.bf16 %v1926_v37, %v1925_v38 }
 0x42e   :  { %v1836_v27 = vpop.f32.mrf.mxu0 }
 0x42f   :  { %v1643_v56 = vpack.c.bf16 %v1611_v35, %v1610_v17  ;;  %v1837_v24 = vadd.f32 %v3087_v49, %v1836_v27 }
 0x431   :  { %1875 = vmatmul.bf16.gmra.mxu0 %v1643_v56  ;;  %v1927_v28 = vmax.f32 %v1837_v24, 0.0 }
 0x436   :  { %v1838_v11 = vpop.f32.mrf.mxu0 }
 0x437   :  { %v1839_v18 = vadd.f32 %v3087_v49, %v1838_v11 }
 0x439   :  { %v1928_v41 = vmax.f32 %v1839_v18, 0.0 }
 0x43b   :  { %v1968_v6 = vpack.c.bf16 %v1928_v41, %v1927_v28 }
 0x43d   :  { %2006 = vmatpush.bf16.xpose.msra.mxu3 %v1968_v6 }
 0x43e   :  { %v1841_v57 = vpop.f32.mrf.mxu0 }
 0x43f   :  { %v1842_v19 = vadd.f32 %v3276_v33, %v1841_v57 }
 0x441   :  { %v1929_v43 = vmax.f32 %v1842_v19, 0.0 }
 0x445   :  { %2007 = vmatpush.bf16.xpose.msra.mxu3 %v1967_v16 }
 0x446   :  { %v1843_v39 = vpop.f32.mrf.mxu0 }
 0x447   :  { %v1844_v49 = vadd.f32 %v3276_v33, %v1843_v39 }
 0x449   :  { %v1930_v44 = vmax.f32 %v1844_v49, 0.0 }
 0x44b   :  { %v3282_v48 = vpack.c.bf16 %v1930_v44, %v1929_v43  ;;  %v2046_v43 = vlaneseq }
 0x44d   :  { %2008 = vmatpush.bf16.xpose.msra.mxu3 %v1966_v52  ;;  %vm2048_vm4 = vcmp.lt.s32.totalorder %v2046_v43, 512 }
 0x44e   :  { %v1846_v0 = vpop.f32.mrf.mxu0 }
 0x44f   :  { %v1847_v3 = vadd.f32 %v3276_v33, %v1846_v0 }
 0x451   :  { %v1931_v59 = vmax.f32 %v1847_v3, 0.0 }
 0x455   :  { %2009 = vmatpush.bf16.xpose.msra.mxu3 %v1965_v61 }
 0x456   :  { %v1848_v54 = vpop.f32.mrf.mxu0 }
 0x457   :  { %v1849_v26 = vadd.f32 %v3276_v33, %v1848_v54 }
 0x459   :  { %v1932_v45 = vmax.f32 %v1849_v26, 0.0 }
 0x45b   :  { %v1970_v5 = vpack.c.bf16 %v1932_v45, %v1931_v59 }
 0x45d   :  { %2010 = vmatpush.bf16.xpose.msra.mxu3 %v3259_v50 }
 0x45e   :  { %v1851_v53 = vpop.f32.mrf.mxu0 }
 0x45f   :  { %v1852_v58 = vadd.f32 %v3276_v33, %v1851_v53 }
 0x461   :  { %v1933_v2 = vmax.f32 %v1852_v58, 0.0 }
 0x465   :  { %2011 = vmatpush.bf16.xpose.msra.mxu3 %v3251_v31 }
 0x466   :  { %v1853_v60 = vpop.f32.mrf.mxu0 }
 0x467   :  { %v1854_v4 = vadd.f32 %v3276_v33, %v1853_v60 }
 0x469   :  { %v1934_v46 = vmax.f32 %v1854_v4, 0.0 }
 0x46b   :  { %v1971_v55 = vpack.c.bf16 %v1934_v46, %v1933_v2 }
 0x46d   :  { %2012 = vmatpush.bf16.xpose.msra.mxu3 %v3243_v23 }
 0x46e   :  { %v1856_v61 = vpop.f32.mrf.mxu0 }
 0x46f   :  { %v1857_v1 = vadd.f32 %v3276_v33, %v1856_v61 }
 0x471   :  { %v1935_v7 = vmax.f32 %v1857_v1, 0.0 }
 0x475   :  { %2013 = vmatpush.bf16.xpose.msra.mxu3 %v3236_v20 }
 0x476   :  { %v1858_v63 = vpop.f32.mrf.mxu0 }
 0x477   :  { %v1859_v50 = vadd.f32 %v3276_v33, %v1858_v63 }
 0x479   :  { %v1936_v29 = vmax.f32 %v1859_v50, 0.0 }
 0x47b   :  { %v1972_v9 = vpack.c.bf16 %v1936_v29, %v1935_v7 }
 0x47c   :  { %2014 = vmatmul.bf16.vlgmr.msra.gmra.mxu3 %v1977_v40 }
 0x47e   :  { %v1861_v31 = vpop.f32.mrf.mxu0 }
 0x47f   :  { %v1862_v12 = vadd.f32 %v3276_v33, %v1861_v31 }
 0x481   :  { %v1937_v14 = vmax.f32 %v1862_v12, 0.0 }
 0x486   :  { %v1863_v10 = vpop.f32.mrf.mxu0 }
 0x487   :  { %v1864_v13 = vadd.f32 %v3276_v33, %v1863_v10 }
 0x489   :  { %v1938_v30 = vmax.f32 %v1864_v13, 0.0 }
 0x48b   :  { %v1973_v23 = vpack.c.bf16 %v1938_v30, %v1937_v14 }
 0x48e   :  { %v1866_v47 = vpop.f32.mrf.mxu0 }
 0x48f   :  { %v1867_v6 = vadd.f32 %v3276_v33, %v1866_v47 }
 0x491   :  { %v1939_v57 = vmax.f32 %v1867_v6, 0.0 }
 0x496   :  { %v1868_v25 = vpop.f32.mrf.mxu0 }
 0x497   :  { %v1869_v28 = vadd.f32 %v3276_v33, %v1868_v25 }
 0x499   :  { %v1940_v36 = vmax.f32 %v1869_v28, 0.0 }
 0x49b   :  { %v1974_v37 = vpack.c.bf16 %v1940_v36, %v1939_v57 }
 0x49e   :  { %v1871_v15 = vpop.f32.mrf.mxu0 }
 0x49f   :  { %v1872_v24 = vadd.f32 %v3276_v33, %v1871_v15 }
 0x4a1   :  { %v1941_v18 = vmax.f32 %v1872_v24, 0.0 }
 0x4a6   :  { %v1873_v32 = vpop.f32.mrf.mxu0 }
 0x4a7   :  { %v1874_v27 = vadd.f32 %v3276_v33, %v1873_v32 }
 0x4a9   :  { %v1942_v11 = vmax.f32 %v1874_v27, 0.0  ;;  %v1989_v38 = vpop.f32.mrf.mxu1 }
 0x4ab   :  { %v1975_v41 = vpack.c.bf16 %v1942_v11, %v1941_v18 }
 0x4ae   :  { %v1876_v20 = vpop.f32.mrf.mxu0 }
 0x4af   :  { %v1877_v8 = vadd.f32 %v3276_v33, %v1876_v20  ;;  %v2002_v34 = vpop.f32.mrf.mxu2 }
 0x4b1   :  { %v1943_v17 = vmax.f32 %v1877_v8, 0.0  ;;  %v1991_v62 = vpop.f32.mrf.mxu1 }
 0x4b6   :  { %v1878_v21 = vpop.f32.mrf.mxu0 }
 0x4b7   :  { %v1879_v22 = vadd.f32 %v3276_v33, %v1878_v21  ;;  %v2004_v19 = vpop.f32.mrf.mxu2  ;;  %v1979_v33 = vstv %s3324_s12 }
 0x4b8   :  { %v2003_v51 = vadd.f32 %v2002_v34, %v1979_v33  ;;  %v1990_v44 = vadd.f32 %v1989_v38, %v1979_v33 }
 0x4b9   :  { %v1944_v35 = vmax.f32 %v1879_v22, 0.0 }
 0x4ba   :  { %v2036_v52 = vrot.slane %v2003_v51, 7 }
 0x4bb   :  { %v1976_v56 = vpack.c.bf16 %v1944_v35, %v1943_v17 }
 0x4bc   :  { %v2040_v54 = vsel %vm2039_vm1, %v1990_v44, %v2036_v52 }
 0x4bd   :  { %2019 = vmatpush.bf16.xpose.msrb.mxu1 %v1976_v56 }
 0x4c5   :  { %2020 = vmatpush.bf16.xpose.msrb.mxu1 %v1975_v41 }
 0x4cd   :  { %2021 = vmatpush.bf16.xpose.msrb.mxu1 %v1974_v37 }
 0x4d5   :  { %2022 = vmatpush.bf16.xpose.msrb.mxu1 %v1973_v23 }
 0x4dd   :  { %2023 = vmatpush.bf16.xpose.msrb.mxu1 %v1972_v9 }
 0x4e5   :  { %2024 = vmatpush.bf16.xpose.msrb.mxu1 %v1971_v55 }
 0x4ed   :  { %2025 = vmatpush.bf16.xpose.msrb.mxu1 %v1970_v5 }
 0x4f5   :  { %2026 = vmatpush.bf16.xpose.msrb.mxu1 %v3282_v48 }
 0x4fc   :  { %2027 = vmatmul.bf16.vlgmr.msrb.gmra.mxu1 %v1977_v40 }
 0x4ff   :  { %v2015_v16 = vpop.f32.mrf.mxu3 }
 0x500   :  { %v2016_v49 = vadd.f32 %v2015_v16, %v1979_v33 }
 0x502   :  { %v2037_v0 = vrot.slane %v2016_v49, 6 }
 0x507   :  { %v2017_v39 = vpop.f32.mrf.mxu3 }
 0x579   :  { %v2028_v42 = vpop.f32.mrf.mxu1 }
 0x57a   :  { %v2029_v3 = vadd.f32 %v2028_v42, %v1979_v33 }
 0x57c   :  { %v2038_v48 = vrot.slane %v2029_v3, 5 }
 0x57e   :  { %v2042_v26 = vsel %vm2041_vm2, %v2037_v0, %v2038_v48 }
 0x57f   :  { %v2044_v59 = vsel %vm2043_vm3, %v2040_v54, %v2042_v26 }
 0x580   :  { %2050 = vst.msk [vmem:[#allocation3] sm:$0xf] %vm2048_vm4, %v2044_v59 }
 0x581   :  { %v2030_v45 = vpop.f32.mrf.mxu1  ;;  %2061 = dma.vmem_to_hbm [thread:$0]  %s2057_s17, 64, %s2059_s18, [#allocation4]  }
 0x582   :  { %2462 = dma.done.wait [#allocation4], 64  }
 0x583   :  { %2463 = vsyncadd [#allocation4], 4294967232 }
 0x584   :  { %2066 = vsyncpa [#allocation4], 1 }

</bundles_post_ra>
